<compile_context>
chip_gen: v7x
topology: tpu7x:2x2x1
jax: 0.10.0
libtpu: 0.0.40
codegen_flags: <defaults>
</compile_context>

<pallas_src>
import functools

import numpy as np
import jax
import jax.numpy as jnp
from jax.experimental import pallas as pl
from jax.experimental.pallas import tpu as pltpu


# Nonzero taps of the PyTorch "laplacian_kernel" (F.conv3d is
# cross-correlation): (sd, sh, sw, sign) relative offsets + coefficient.
#   (-1 @ [d-1,h,w]) (+1 @ [d-1,h+1,w]) (-1 @ [d,h,w-1])
#   (-1 @ [d,h,w+1]) (-1 @ [d+1,h,w])  (+1 @ [d+1,h+1,w])   (+4 @ center)
_TAPS = ((-1, 0, 0, -1.0), (-1, 1, 0, +1.0),
         (0, 0, -1, -1.0), (0, 0, +1, -1.0),
         (+1, 0, 0, -1.0), (+1, 1, 0, +1.0))


def _build_geometry(D, H, W):
    """Grid-invariant lane masks, packed lane-dense as one (6 + log2(W), N)
    float32 array (constant, DMA'd once and VMEM-resident across the grid):
      rows 0..5          signed validity masks for the 3x3x3 stencil taps
                         (zero padding at the volume boundary),
      rows 6..6+log2(W)  wrap-select masks for the softmax-over-W butterfly.
    """
    N = D * H * W
    n = np.arange(N)
    d, h, w = n // (H * W), (n // W) % H, n % W
    rows = []
    for sd, sh, sw, sign in _TAPS:
        ok = ((d + sd >= 0) & (d + sd < D) &
              (h + sh >= 0) & (h + sh < H) &
              (w + sw >= 0) & (w + sw < W))
        rows.append(sign * ok.astype(np.float32))
    s = 1
    while s < W:
        rows.append((w < W - s).astype(np.float32))
        s *= 2
    return np.stack(rows, axis=0).astype(np.float32)


def _dpa_kernel(x_ref, geom_ref, wqkv_ref, bqkv_ref, wo_ref, bo_ref, o_ref,
                *, D, H, W):
    C = x_ref.shape[1]
    N = D * H * W
    HW = H * W

    x = x_ref[0]                                             # (C, N) lane-dense
    geom = geom_ref[...]                                     # (6+log2W, N), resident

    # Fused 1x1x1 Q/K/V convs: a single (3C, C) @ (C, N) MXU push + bias.
    qkv = jnp.dot(wqkv_ref[...], x,
                  preferred_element_type=jnp.float32) + bqkv_ref[...]
    q = qkv[0 * C:1 * C, :]                                  # sublane-aligned slices
    k = qkv[1 * C:2 * C, :]
    v = qkv[2 * C:3 * C, :]
    qk = q * k            # independent of dyn_win -> overlaps the roll chain

    # significance mask: Q >= mean over the spatial volume, per channel
    avg_q = jnp.mean(q, axis=1, keepdims=True)               # (C, 1)
    a_s = (q >= avg_q).astype(jnp.float32)                   # (C, N)

    # Depthwise 3x3x3 "laplacian" stencil (zero padding) via circular rolls
    # along the flattened lane axis.  Circularly wrapped values are exactly
    # the out-of-volume taps; the precomputed signed masks zero them and fold
    # in the +/-1 stencil coefficient.
    def tap(t):
        sd, sh, sw, _ = _TAPS[t]
        shift = (-(sd * HW + sh * W + sw)) % N
        r = pltpu.roll(a_s, shift, axis=1)                   # r[n] = a_s[n + off]
        return r * geom[t:t + 1, :]                          # (C, N)

    # balanced add tree (shorter dependency chain than a left-to-right sum)
    edge = ((tap(0) + tap(1)) + (tap(2) + tap(3))) \
         + ((tap(4) + tap(5)) + 4.0 * a_s)
    dyn_win = (edge > 0.0).astype(jnp.float32)               # (C, N)

    # dyn_win is {0,1}, so (Q*dw)*(K*dw) == (Q*K)*dw -- one mul saved and the
    # Q*K product was already computed off the critical path.
    scores = jnp.sum(qk * dyn_win, axis=0, keepdims=True) * (1.0 / (C ** 0.5))
    v_dw = v * dyn_win

    # Output 1x1x1 conv commutes with the per-column softmax scaling:
    #   Wo @ (aw * V_dw) == (Wo @ V_dw) * aw
    # Issue the MXU matmul now so its latency hides under the softmax.
    ov = jnp.dot(wo_ref[...], v_dw, preferred_element_type=jnp.float32)

    # softmax over the last spatial dim (W): every group of W consecutive
    # lanes is all-reduced with a group-circular doubling butterfly (XLU
    # rolls + VPU selects), so no (1,N)<->(D*H,W) relayouts are needed.
    def grp_shift(vec, s, wrap_ok):
        a = pltpu.roll(vec, (N - s) % N, axis=1)             # vec[n + s]
        b = pltpu.roll(vec, W - s, axis=1)                   # vec[n + s - W]
        return jnp.where(wrap_ok, a, b)

    n_steps = W.bit_length() - 1                             # log2(W)
    wraps = [geom[6 + i:7 + i, :] > 0.5 for i in range(n_steps)]

    m = scores
    for i in range(n_steps):
        m = jnp.maximum(m, grp_shift(m, 1 << i, wraps[i]))
    e = jnp.exp(scores - m)
    denom = e
    for i in range(n_steps):
        denom = denom + grp_shift(denom, 1 << i, wraps[i])
    aw = e * pl.reciprocal(denom, approx=True)               # (1, N)

    o_ref[0] = ov * aw + bo_ref[...]                         # lane-dense store


def dynamic_positioning_attention_3d(x_ncdhw, params):
    """x_ncdhw: (B, C, D, H, W) float32.  Returns (B, C, D, H, W)."""
    B, C, D, H, W = x_ncdhw.shape
    N = D * H * W
    # butterfly softmax over W assumes a power-of-two W
    assert W > 0 and W & (W - 1) == 0, "W must be a power of two"

    x = x_ncdhw.reshape(B, C, N).astype(jnp.float32)          # free view, no transpose

    # grid-invariant geometry masks (constant-folded by XLA, resident in VMEM)
    geom = jnp.asarray(_build_geometry(D, H, W))              # (6+log2W, N)
    G = geom.shape[0]

    # fuse Q/K/V weights into one (3C, C) matmul operand; biases as columns
    wqkv = jnp.concatenate([params["wq"], params["wk"], params["wv"]], axis=0)
    bqkv = jnp.concatenate(
        [params["bq"], params["bk"], params["bv"]]).reshape(3 * C, 1)
    wo = params["wo"]
    bo = params["bo"].reshape(C, 1)

    kernel = functools.partial(_dpa_kernel, D=D, H=H, W=W)
    x_spec = pl.BlockSpec((1, C, N), lambda b: (b, 0, 0))

    out = pl.pallas_call(
        kernel,
        out_shape=jax.ShapeDtypeStruct((B, C, N), jnp.float32),
        grid_spec=pltpu.PrefetchScalarGridSpec(
            num_scalar_prefetch=0,
            grid=(B,),
            in_specs=[x_spec,
                      pl.BlockSpec((G, N), lambda b: (0, 0)),
                      pl.BlockSpec((3 * C, C), lambda b: (0, 0)),
                      pl.BlockSpec((3 * C, 1), lambda b: (0, 0)),
                      pl.BlockSpec((C, C), lambda b: (0, 0)),
                      pl.BlockSpec((C, 1), lambda b: (0, 0))],
            out_specs=x_spec,
        ),
        compiler_params=pltpu.CompilerParams(
            dimension_semantics=("parallel",)),      # batches -> 2 TCs on v7x
    )(x, geom, wqkv, bqkv, wo, bo)

    return out.reshape(B, C, D, H, W)


def reference_forward(x, params):
    """Pure-JAX (XLA) reference matching the PyTorch forward semantics."""
    B, C, D, H, W = x.shape

    def conv1x1(inp, w, b):
        return jnp.einsum('bcdhw,oc->bodhw', inp, w) + b[None, :, None, None, None]

    Q = conv1x1(x, params["wq"], params["bq"])
    K = conv1x1(x, params["wk"], params["bk"])
    V = conv1x1(x, params["wv"], params["bv"])

    avg_Q = jnp.mean(Q, axis=(2, 3, 4), keepdims=True)
    A_S = (Q >= avg_Q).astype(jnp.float32)

    Ap = jnp.pad(A_S, ((0, 0), (0, 0), (1, 1), (1, 1), (1, 1)))

    def nb(sd, sh, sw):
        return Ap[:, :, 1 + sd:1 + sd + D, 1 + sh:1 + sh + H, 1 + sw:1 + sw + W]

    edge = (-nb(-1, 0, 0) + nb(-1, 1, 0)
            - nb(0, 0, -1) + 4.0 * A_S - nb(0, 0, 1)
            - nb(1, 0, 0) + nb(1, 1, 0))
    dyn_win = (edge > 0.0).astype(jnp.float32)

    Qd, Kd, Vd = Q * dyn_win, K * dyn_win, V * dyn_win
    scores = jnp.einsum('bcdhw,bcdhw->bdhw', Qd, Kd) / (C ** 0.5)
    aw = jax.nn.softmax(scores, axis=-1)
    att = aw[:, None] * Vd
    return conv1x1(att, params["wo"], params["bo"])


if __name__ == "__main__":
    B, C, D, H, W = 2, 8, 4, 8, 16

    key = jax.random.PRNGKey(0)
    keys = jax.random.split(key, 9)
    x = jax.random.normal(keys[0], (B, C, D, H, W), dtype=jnp.float32)

    params = {
        "wq": 0.2 * jax.random.normal(keys[1], (C, C), dtype=jnp.float32),
        "bq": 0.1 * jax.random.normal(keys[2], (C,), dtype=jnp.float32),
        "wk": 0.2 * jax.random.normal(keys[3], (C, C), dtype=jnp.float32),
        "bk": 0.1 * jax.random.normal(keys[4], (C,), dtype=jnp.float32),
        "wv": 0.2 * jax.random.normal(keys[5], (C, C), dtype=jnp.float32),
        "bv": 0.1 * jax.random.normal(keys[6], (C,), dtype=jnp.float32),
        "wo": 0.2 * jax.random.normal(keys[7], (C, C), dtype=jnp.float32),
        "bo": 0.1 * jax.random.normal(keys[8], (C,), dtype=jnp.float32),
    }

    out = dynamic_positioning_attention_3d(x, params)
    out = jax.block_until_ready(out)
    assert out.shape == (B, C, D, H, W)

    ref = reference_forward(x, params)
    # thresholded-mask ops (>=, >) can flip on float ties between MXU and XLA
    # reductions; require the overwhelming majority of voxels to match.
    mismatch_frac = float(jnp.mean((jnp.abs(out - ref) > 1e-3).astype(jnp.float32)))
    assert mismatch_frac < 0.01, f"mismatch fraction too high: {mismatch_frac}"

    print("KERNEL_OK")
</pallas_src>

<mosaic_0001>
module attributes {stable_mosaic.version = 11 : i64} {
  func.func @_dpa_kernel(%arg0: i32, %arg1: memref<1x8x512xf32, #tpu.memory_space<vmem>>, %arg2: memref<10x512xf32, #tpu.memory_space<vmem>>, %arg3: memref<24x8xf32, #tpu.memory_space<vmem>>, %arg4: memref<24x1xf32, #tpu.memory_space<vmem>>, %arg5: memref<8x8xf32, #tpu.memory_space<vmem>>, %arg6: memref<8x1xf32, #tpu.memory_space<vmem>>, %arg7: memref<1x8x512xf32, #tpu.memory_space<vmem>>) attributes {dimension_semantics = [#tpu.dimension_semantics<parallel>], iteration_bounds = array<i64: 2>, scalar_prefetch = 0 : i64, scratch_operands = 0 : i64, tpu.core_type = #tpu.core_type<tc>, window_params = [{transform_indices = @transform_0, window_bounds = array<i64: 1, 8, 512>}, {pipeline_mode = #tpu.pipeline_mode<synchronous>, transform_indices = @transform_1, window_bounds = array<i64: 10, 512>}, {pipeline_mode = #tpu.pipeline_mode<synchronous>, transform_indices = @transform_2, window_bounds = array<i64: 24, 8>}, {pipeline_mode = #tpu.pipeline_mode<synchronous>, transform_indices = @transform_3, window_bounds = array<i64: 24, 1>}, {pipeline_mode = #tpu.pipeline_mode<synchronous>, transform_indices = @transform_4, window_bounds = array<i64: 8, 8>}, {pipeline_mode = #tpu.pipeline_mode<synchronous>, transform_indices = @transform_5, window_bounds = array<i64: 8, 1>}, {transform_indices = @transform_6, window_bounds = array<i64: 1, 8, 512>}]} {
    %c0 = arith.constant 0 : index
    %c0_0 = arith.constant 0 : index
    %c0_1 = arith.constant 0 : index
    %0 = vector.load %arg1[%c0, %c0_0, %c0_1] : memref<1x8x512xf32, #tpu.memory_space<vmem>>, vector<1x8x512xf32>
    %1 = vector.shape_cast %0 : vector<1x8x512xf32> to vector<8x512xf32>
    %c0_2 = arith.constant 0 : index
    %c0_3 = arith.constant 0 : index
    %2 = vector.load %arg2[%c0_2, %c0_3] : memref<10x512xf32, #tpu.memory_space<vmem>>, vector<10x512xf32>
    %c0_4 = arith.constant 0 : index
    %c0_5 = arith.constant 0 : index
    %3 = vector.load %arg3[%c0_4, %c0_5] : memref<24x8xf32, #tpu.memory_space<vmem>>, vector<24x8xf32>
    %cst = arith.constant dense<0.000000e+00> : vector<24x512xf32>
    %4 = tpu.matmul %3, %1, %cst {dimension_numbers = #tpu.dot_dimension_numbers<[1], [0], [0], [1], [0, 0, 1, 1], [], []>} : vector<24x8xf32>, vector<8x512xf32>, vector<24x512xf32> -> vector<24x512xf32>
    %c0_6 = arith.constant 0 : index
    %c0_7 = arith.constant 0 : index
    %5 = vector.load %arg4[%c0_6, %c0_7] : memref<24x1xf32, #tpu.memory_space<vmem>>, vector<24x1xf32>
    %6 = vector.broadcast %5 : vector<24x1xf32> to vector<24x512xf32>
    %7 = arith.addf %4, %6 : vector<24x512xf32>
    %8 = vector.extract_strided_slice %7 {offsets = [0, 0], sizes = [8, 512], strides = [1, 1]} : vector<24x512xf32> to vector<8x512xf32>
    %9 = vector.extract_strided_slice %7 {offsets = [8, 0], sizes = [8, 512], strides = [1, 1]} : vector<24x512xf32> to vector<8x512xf32>
    %10 = vector.extract_strided_slice %7 {offsets = [16, 0], sizes = [8, 512], strides = [1, 1]} : vector<24x512xf32> to vector<8x512xf32>
    %11 = arith.mulf %8, %9 : vector<8x512xf32>
    %cst_8 = arith.constant dense<0.000000e+00> : vector<8xf32>
    %12 = vector.multi_reduction <add>, %8, %cst_8 [1] : vector<8x512xf32> to vector<8xf32>
    %13 = vector.shape_cast %12 : vector<8xf32> to vector<8x1xf32>
    %cst_9 = arith.constant 5.120000e+02 : f32
    %14 = vector.broadcast %cst_9 : f32 to vector<8x1xf32>
    %15 = arith.divf %13, %14 : vector<8x1xf32>
    %16 = vector.broadcast %15 : vector<8x1xf32> to vector<8x512xf32>
    %17 = arith.cmpf oge, %8, %16 : vector<8x512xf32>
    %18 = arith.extui %17 : vector<8x512xi1> to vector<8x512xi32>
    %19 = arith.sitofp %18 : vector<8x512xi32> to vector<8x512xf32>
    %c128_i32 = arith.constant 128 : i32
    %20 = tpu.dynamic_rotate %19 by %c128_i32 dim 1 : vector<8x512xf32>, i32 -> vector<8x512xf32>
    %21 = vector.extract_strided_slice %2 {offsets = [0, 0], sizes = [1, 512], strides = [1, 1]} : vector<10x512xf32> to vector<1x512xf32>
    %22 = vector.broadcast %21 : vector<1x512xf32> to vector<8x512xf32>
    %23 = arith.mulf %20, %22 : vector<8x512xf32>
    %c112_i32 = arith.constant 112 : i32
    %24 = tpu.dynamic_rotate %19 by %c112_i32 dim 1 : vector<8x512xf32>, i32 -> vector<8x512xf32>
    %25 = vector.extract_strided_slice %2 {offsets = [1, 0], sizes = [1, 512], strides = [1, 1]} : vector<10x512xf32> to vector<1x512xf32>
    %26 = vector.broadcast %25 : vector<1x512xf32> to vector<8x512xf32>
    %27 = arith.mulf %24, %26 : vector<8x512xf32>
    %28 = arith.addf %23, %27 : vector<8x512xf32>
    %c1_i32 = arith.constant 1 : i32
    %29 = tpu.dynamic_rotate %19 by %c1_i32 dim 1 : vector<8x512xf32>, i32 -> vector<8x512xf32>
    %30 = vector.extract_strided_slice %2 {offsets = [2, 0], sizes = [1, 512], strides = [1, 1]} : vector<10x512xf32> to vector<1x512xf32>
    %31 = vector.broadcast %30 : vector<1x512xf32> to vector<8x512xf32>
    %32 = arith.mulf %29, %31 : vector<8x512xf32>
    %c511_i32 = arith.constant 511 : i32
    %33 = tpu.dynamic_rotate %19 by %c511_i32 dim 1 : vector<8x512xf32>, i32 -> vector<8x512xf32>
    %34 = vector.extract_strided_slice %2 {offsets = [3, 0], sizes = [1, 512], strides = [1, 1]} : vector<10x512xf32> to vector<1x512xf32>
    %35 = vector.broadcast %34 : vector<1x512xf32> to vector<8x512xf32>
    %36 = arith.mulf %33, %35 : vector<8x512xf32>
    %37 = arith.addf %32, %36 : vector<8x512xf32>
    %38 = arith.addf %28, %37 : vector<8x512xf32>
    %c384_i32 = arith.constant 384 : i32
    %39 = tpu.dynamic_rotate %19 by %c384_i32 dim 1 : vector<8x512xf32>, i32 -> vector<8x512xf32>
    %40 = vector.extract_strided_slice %2 {offsets = [4, 0], sizes = [1, 512], strides = [1, 1]} : vector<10x512xf32> to vector<1x512xf32>
    %41 = vector.broadcast %40 : vector<1x512xf32> to vector<8x512xf32>
    %42 = arith.mulf %39, %41 : vector<8x512xf32>
    %c368_i32 = arith.constant 368 : i32
    %43 = tpu.dynamic_rotate %19 by %c368_i32 dim 1 : vector<8x512xf32>, i32 -> vector<8x512xf32>
    %44 = vector.extract_strided_slice %2 {offsets = [5, 0], sizes = [1, 512], strides = [1, 1]} : vector<10x512xf32> to vector<1x512xf32>
    %45 = vector.broadcast %44 : vector<1x512xf32> to vector<8x512xf32>
    %46 = arith.mulf %43, %45 : vector<8x512xf32>
    %47 = arith.addf %42, %46 : vector<8x512xf32>
    %cst_10 = arith.constant 4.000000e+00 : f32
    %48 = vector.broadcast %cst_10 : f32 to vector<8x512xf32>
    %49 = arith.mulf %48, %19 : vector<8x512xf32>
    %50 = arith.addf %47, %49 : vector<8x512xf32>
    %51 = arith.addf %38, %50 : vector<8x512xf32>
    %cst_11 = arith.constant 0.000000e+00 : f32
    %52 = vector.broadcast %cst_11 : f32 to vector<8x512xf32>
    %53 = arith.cmpf ogt, %51, %52 : vector<8x512xf32>
    %54 = arith.extui %53 : vector<8x512xi1> to vector<8x512xi32>
    %55 = arith.sitofp %54 : vector<8x512xi32> to vector<8x512xf32>
    %56 = arith.mulf %11, %55 : vector<8x512xf32>
    %cst_12 = arith.constant dense<0.000000e+00> : vector<512xf32>
    %57 = vector.multi_reduction <add>, %56, %cst_12 [0] : vector<8x512xf32> to vector<512xf32>
    %58 = vector.shape_cast %57 : vector<512xf32> to vector<1x512xf32>
    %cst_13 = arith.constant 0.353553385 : f32
    %59 = vector.broadcast %cst_13 : f32 to vector<1x512xf32>
    %60 = arith.mulf %58, %59 : vector<1x512xf32>
    %61 = arith.mulf %10, %55 : vector<8x512xf32>
    %c0_14 = arith.constant 0 : index
    %c0_15 = arith.constant 0 : index
    %62 = vector.load %arg5[%c0_14, %c0_15] : memref<8x8xf32, #tpu.memory_space<vmem>>, vector<8x8xf32>
    %cst_16 = arith.constant dense<0.000000e+00> : vector<8x512xf32>
    %63 = tpu.matmul %62, %61, %cst_16 {dimension_numbers = #tpu.dot_dimension_numbers<[1], [0], [0], [1], [0, 0, 1, 1], [], []>} : vector<8x8xf32>, vector<8x512xf32>, vector<8x512xf32> -> vector<8x512xf32>
    %64 = vector.extract_strided_slice %2 {offsets = [6, 0], sizes = [1, 512], strides = [1, 1]} : vector<10x512xf32> to vector<1x512xf32>
    %cst_17 = arith.constant 5.000000e-01 : f32
    %65 = vector.broadcast %cst_17 : f32 to vector<1x512xf32>
    %66 = arith.cmpf ogt, %64, %65 : vector<1x512xf32>
    %67 = vector.extract_strided_slice %2 {offsets = [7, 0], sizes = [1, 512], strides = [1, 1]} : vector<10x512xf32> to vector<1x512xf32>
    %cst_18 = arith.constant 5.000000e-01 : f32
    %68 = vector.broadcast %cst_18 : f32 to vector<1x512xf32>
    %69 = arith.cmpf ogt, %67, %68 : vector<1x512xf32>
    %70 = vector.extract_strided_slice %2 {offsets = [8, 0], sizes = [1, 512], strides = [1, 1]} : vector<10x512xf32> to vector<1x512xf32>
    %cst_19 = arith.constant 5.000000e-01 : f32
    %71 = vector.broadcast %cst_19 : f32 to vector<1x512xf32>
    %72 = arith.cmpf ogt, %70, %71 : vector<1x512xf32>
    %73 = vector.extract_strided_slice %2 {offsets = [9, 0], sizes = [1, 512], strides = [1, 1]} : vector<10x512xf32> to vector<1x512xf32>
    %cst_20 = arith.constant 5.000000e-01 : f32
    %74 = vector.broadcast %cst_20 : f32 to vector<1x512xf32>
    %75 = arith.cmpf ogt, %73, %74 : vector<1x512xf32>
    %c511_i32_21 = arith.constant 511 : i32
    %76 = tpu.dynamic_rotate %60 by %c511_i32_21 dim 1 : vector<1x512xf32>, i32 -> vector<1x512xf32>
    %c15_i32 = arith.constant 15 : i32
    %77 = tpu.dynamic_rotate %60 by %c15_i32 dim 1 : vector<1x512xf32>, i32 -> vector<1x512xf32>
    %78 = arith.select %66, %76, %77 : vector<1x512xi1>, vector<1x512xf32>
    %79 = arith.maximumf %60, %78 : vector<1x512xf32>
    %c510_i32 = arith.constant 510 : i32
    %80 = tpu.dynamic_rotate %79 by %c510_i32 dim 1 : vector<1x512xf32>, i32 -> vector<1x512xf32>
    %c14_i32 = arith.constant 14 : i32
    %81 = tpu.dynamic_rotate %79 by %c14_i32 dim 1 : vector<1x512xf32>, i32 -> vector<1x512xf32>
    %82 = arith.select %69, %80, %81 : vector<1x512xi1>, vector<1x512xf32>
    %83 = arith.maximumf %79, %82 : vector<1x512xf32>
    %c508_i32 = arith.constant 508 : i32
    %84 = tpu.dynamic_rotate %83 by %c508_i32 dim 1 : vector<1x512xf32>, i32 -> vector<1x512xf32>
    %c12_i32 = arith.constant 12 : i32
    %85 = tpu.dynamic_rotate %83 by %c12_i32 dim 1 : vector<1x512xf32>, i32 -> vector<1x512xf32>
    %86 = arith.select %72, %84, %85 : vector<1x512xi1>, vector<1x512xf32>
    %87 = arith.maximumf %83, %86 : vector<1x512xf32>
    %c504_i32 = arith.constant 504 : i32
    %88 = tpu.dynamic_rotate %87 by %c504_i32 dim 1 : vector<1x512xf32>, i32 -> vector<1x512xf32>
    %c8_i32 = arith.constant 8 : i32
    %89 = tpu.dynamic_rotate %87 by %c8_i32 dim 1 : vector<1x512xf32>, i32 -> vector<1x512xf32>
    %90 = arith.select %75, %88, %89 : vector<1x512xi1>, vector<1x512xf32>
    %91 = arith.maximumf %87, %90 : vector<1x512xf32>
    %92 = arith.subf %60, %91 : vector<1x512xf32>
    %93 = math.exp %92 : vector<1x512xf32>
    %c511_i32_22 = arith.constant 511 : i32
    %94 = tpu.dynamic_rotate %93 by %c511_i32_22 dim 1 : vector<1x512xf32>, i32 -> vector<1x512xf32>
    %c15_i32_23 = arith.constant 15 : i32
    %95 = tpu.dynamic_rotate %93 by %c15_i32_23 dim 1 : vector<1x512xf32>, i32 -> vector<1x512xf32>
    %96 = arith.select %66, %94, %95 : vector<1x512xi1>, vector<1x512xf32>
    %97 = arith.addf %93, %96 : vector<1x512xf32>
    %c510_i32_24 = arith.constant 510 : i32
    %98 = tpu.dynamic_rotate %97 by %c510_i32_24 dim 1 : vector<1x512xf32>, i32 -> vector<1x512xf32>
    %c14_i32_25 = arith.constant 14 : i32
    %99 = tpu.dynamic_rotate %97 by %c14_i32_25 dim 1 : vector<1x512xf32>, i32 -> vector<1x512xf32>
    %100 = arith.select %69, %98, %99 : vector<1x512xi1>, vector<1x512xf32>
    %101 = arith.addf %97, %100 : vector<1x512xf32>
    %c508_i32_26 = arith.constant 508 : i32
    %102 = tpu.dynamic_rotate %101 by %c508_i32_26 dim 1 : vector<1x512xf32>, i32 -> vector<1x512xf32>
    %c12_i32_27 = arith.constant 12 : i32
    %103 = tpu.dynamic_rotate %101 by %c12_i32_27 dim 1 : vector<1x512xf32>, i32 -> vector<1x512xf32>
    %104 = arith.select %72, %102, %103 : vector<1x512xi1>, vector<1x512xf32>
    %105 = arith.addf %101, %104 : vector<1x512xf32>
    %c504_i32_28 = arith.constant 504 : i32
    %106 = tpu.dynamic_rotate %105 by %c504_i32_28 dim 1 : vector<1x512xf32>, i32 -> vector<1x512xf32>
    %c8_i32_29 = arith.constant 8 : i32
    %107 = tpu.dynamic_rotate %105 by %c8_i32_29 dim 1 : vector<1x512xf32>, i32 -> vector<1x512xf32>
    %108 = arith.select %75, %106, %107 : vector<1x512xi1>, vector<1x512xf32>
    %109 = arith.addf %105, %108 : vector<1x512xf32>
    %110 = tpu.reciprocal %109 {approx = true} : vector<1x512xf32> -> vector<1x512xf32>
    %111 = arith.mulf %93, %110 : vector<1x512xf32>
    %112 = vector.broadcast %111 : vector<1x512xf32> to vector<8x512xf32>
    %113 = arith.mulf %63, %112 : vector<8x512xf32>
    %c0_30 = arith.constant 0 : index
    %c0_31 = arith.constant 0 : index
    %114 = vector.load %arg6[%c0_30, %c0_31] : memref<8x1xf32, #tpu.memory_space<vmem>>, vector<8x1xf32>
    %115 = vector.broadcast %114 : vector<8x1xf32> to vector<8x512xf32>
    %116 = arith.addf %113, %115 : vector<8x512xf32>
    %c0_32 = arith.constant 0 : index
    %c0_33 = arith.constant 0 : index
    %c0_34 = arith.constant 0 : index
    %117 = vector.load %arg7[%c0_32, %c0_33, %c0_34] : memref<1x8x512xf32, #tpu.memory_space<vmem>>, vector<1x8x512xf32>
    %118 = vector.shape_cast %117 : vector<1x8x512xf32> to vector<8x512xf32>
    %119 = vector.shape_cast %116 : vector<8x512xf32> to vector<1x8x512xf32>
    tpu.vector_store %arg7[%c0_32, %c0_33, %c0_34], %119 {strides = array<i32>} : memref<1x8x512xf32, #tpu.memory_space<vmem>>, vector<1x8x512xf32>,
    return
  }
  func.func @transform_0(%arg0: i32) -> (i32, i32, i32) {
    %c0_i32 = arith.constant 0 : i32
    %c0_i32_0 = arith.constant 0 : i32
    %c0_i32_1 = arith.constant 0 : i32
    return %arg0, %c0_i32, %c0_i32_0 : i32, i32, i32
  }
  func.func @transform_1(%arg0: i32) -> (i32, i32) {
    %c0_i32 = arith.constant 0 : i32
    %c0_i32_0 = arith.constant 0 : i32
    %c0_i32_1 = arith.constant 0 : i32
    return %c0_i32, %c0_i32_0 : i32, i32
  }
  func.func @transform_2(%arg0: i32) -> (i32, i32) {
    %c0_i32 = arith.constant 0 : i32
    %c0_i32_0 = arith.constant 0 : i32
    %c0_i32_1 = arith.constant 0 : i32
    return %c0_i32, %c0_i32_0 : i32, i32
  }
  func.func @transform_3(%arg0: i32) -> (i32, i32) {
    %c0_i32 = arith.constant 0 : i32
    %c0_i32_0 = arith.constant 0 : i32
    %c0_i32_1 = arith.constant 0 : i32
    return %c0_i32, %c0_i32_0 : i32, i32
  }
  func.func @transform_4(%arg0: i32) -> (i32, i32) {
    %c0_i32 = arith.constant 0 : i32
    %c0_i32_0 = arith.constant 0 : i32
    %c0_i32_1 = arith.constant 0 : i32
    return %c0_i32, %c0_i32_0 : i32, i32
  }
  func.func @transform_5(%arg0: i32) -> (i32, i32) {
    %c0_i32 = arith.constant 0 : i32
    %c0_i32_0 = arith.constant 0 : i32
    %c0_i32_1 = arith.constant 0 : i32
    return %c0_i32, %c0_i32_0 : i32, i32
  }
  func.func @transform_6(%arg0: i32) -> (i32, i32, i32) {
    %c0_i32 = arith.constant 0 : i32
    %c0_i32_0 = arith.constant 0 : i32
    %c0_i32_1 = arith.constant 0 : i32
    return %arg0, %c0_i32, %c0_i32_0 : i32, i32, i32
  }
}

</mosaic_0001>

<bundles_post_ra>
// kernel: tpu_custom_call.1
= control target key start
LH: loop header
LB: loop body
LE: loop exit
PB: predicated region body
PF: predicated region fallthrough
CT: control target
= control target key end

     0   :  { %11 = vsyncpa [#allocation3], 0  ;;  %s2575_s0 = inlined_call_operand.vmem [shape: f32[2,8,512], index: 0, kind: input, shape index: {}]   ;;  %s2576_s1 = inlined_call_operand.hbm [shape: f32[10,512], index: 1, kind: input, shape index: {}]   ;;  %s2577_s2 = inlined_call_operand.vmem [shape: f32[24,8], index: 2, kind: input, shape index: {}]   ;;  %s2578_s3 = inlined_call_operand.vmem [shape: f32[24,1], index: 3, kind: input, shape index: {}]   ;;  %s2579_s4 = inlined_call_operand.vmem [shape: f32[8,8], index: 4, kind: input, shape index: {}]   ;;  %s2580_s5 = inlined_call_operand.vmem [shape: f32[8,1], index: 5, kind: input, shape index: {}]   ;;  %s2581_s6 = inlined_call_operand.hbm [shape: f32[2,8,512], index: 6, kind: output, shape index: {}]  }
   0x1   :  { %12 = vsyncpa [#allocation4], 0 }
   0x2   :  { %14 = vsyncpa [#allocation4 + $0x1], 0  ;;  %s1882_s21 = smov 0   ;;  %s1884_s22 = smov 0  }
   0x3   :  { %s1886_s23 = smov 0   ;;  %s1888_s24 = smov 0  }
   0x4 LB: > { %s1903_s25 = sadd.s32 4294967295, %s1829_s24   ;;  %s1591_s26 = sadd.s32 4294967294, %s1829_s24   ;;  %s1829_s24 = sphi %s1888_s24, %s2602_s24   ;;  %s1825_s23 = sphi %s1886_s23, %s2601_s23   ;;  %s1821_s22 = sphi %s1884_s22, %s2600_s22   ;;  %s1817_s21 = sphi %s1882_s21, %s2599_s21  }
   0x5   : > { %s1907_s27 = sadd.s32 1, %s1829_s24   ;;  %s158_s28 = sadd.s32 1, %s1825_s23 }
   0x6   : > { %s155_s29 = ssub.s32 %s1829_s24, %s1907_s27  ;;  %p168_p0 = scmp.ne.s32.totalorder %s1825_s23, %s1821_s22 }
   0x7   : > { %p156_p1 = scmp.eq.s32.totalorder %s155_s29, 0  ;;  %p169_p2 = scmp.eq.s32.totalorder %s1903_s25, 1 }
   0x8   : > { %p174_p3 = scmp.ne.s32.totalorder %s1821_s22, %s1817_s21  ;;  %p175_p4 = scmp.eq.s32.totalorder %s1591_s26, 1 }
   0x9   : > { %s1918_s30 = scalar_select %p156_p1, %s1825_s23, %s158_s28  }
   0xa   : > { %p1920_p5 = por %p169_p2, %p168_p0  ;;  %p1924_p6 = por %p175_p4, %p174_p3 }
   0xb   : > { %p1592_p7 = scmp.ge.s32.totalorder %s1829_s24, 1  ;;  %p182_p8 = scmp.lt.s32.totalorder %s1829_s24, 3 }
   0xc   : > { %s2586_s7 = scalar_select %p1920_p5, 1, 0 }
   0xd   : > { %s2587_s8 = scalar_select %p1924_p6, 1, 0 }
   0xe   : > { %p2582_p9 = scmp.eq.s32.totalorder %s1903_s25, 0  ;;  %p1931_p10 = pnand %p1592_p7, %p182_p8 }
   0xf   : > { %s1831_s10 = smov [#allocation2]   ;;  %s1735_s15 = scalar_lea.hbm %s2576_s1, 1024 }
  0x10   : > { %s2588_s9 = scalar_select %p1931_p10, 1, 0 }
  0x11   : > { %s194_s11 = sshll.u32 %s1831_s10, 4  ;;  %p1629_p11 = pneg %p1931_p10  ;;  %s195_s11 = int_to_ptr.vmem [resolvable:$true] %s194_s11 }
  0x12   : > { %p1736_p13 = scmp.ne.s32.totalorder %s2576_s1, %s1735_s15  ;;  %p1742_p3 = scmp.lt.u32.totalorder %s1735_s15, %s2576_s1 }
  0x13   : > { %p1939_p12 = pnand %p2582_p9, %p1629_p11 }
  0x15   : > { %p1737_p0 = pneg %p1939_p12 }
  0x17   : > { %p1738_p1 = pnand %p1737_p0, %p1736_p13 }
  0x19   : > { %p1739_p2 = pneg %p1738_p1 }
  0x1b   : > { %p1744_p4 = pnand %p1742_p3, %p1739_p2 }
  0x1d   : > { %1747 = shalt.err (!%p1744_p4)
}
  0x1e   : > { %s1748_s20 = scalar_lea.vmem %s195_s11, 1024  ;;  %p1756_p9 = scmp.lt.s32.totalorder %s195_s11, %s195_s11 }
  0x1f   : > { %p1749_p7 = scmp.ne.s32.totalorder %s195_s11, %s1748_s20  ;;  %p1757_p6 = scmp.lt.s32.totalorder %s1748_s20, %s1748_s20 }
  0x21   : > { %p1751_p8 = pnand %p1749_p7, %p1737_p0  ;;  %p1758_p5 = por %p1757_p6, %p1756_p9 }
  0x23   : > { %p1752_p11 = pneg %p1751_p8 }
  0x25   : > { %p1759_p10 = pnand %p1758_p5, %p1752_p11 }
  0x27   : > { %1762 = shalt.err (!%p1759_p10)
}
  0x28   : > { %s1832_s26 = smov 512   ;;  %s1833_s28 = smov 32  }
  0x29   : > { %1632 = dma.hbm_to_vmem [thread:$0]  (!%p1939_p12), %s2576_s1, 1024, %s195_s11, [#allocation3], %s1832_s26, %s1832_s26, %s1833_s28  }
  0x2a   : > { %p2590_p13 = scmp.ne.s32.totalorder %s2588_s9, 0 }
  0x2b   : > { %p2591_p1 = scmp.eq.s32.totalorder (!%p2590_p13), %s1903_s25, 0 }
  0x2c   : > { %230 = sbr.rel (%p2590_p13) target bundleno = 1726 (0x6be), region = 44 }
  0x33   : > { %1808 = dma.done.wait (%p2591_p1), [#allocation3], 1024   ;;  %p2592_p0 = pmov %p2591_p1 }
  0x34   : > { %p260_p5 = scmp.lt.s32.totalorder %s1903_s25, 1  ;;  %v1834_v0 = vmov 0.0   ;;  %v1835_v1 = vmov 0   ;;  %vm298_vm0 = vcmask 64512   ;;  %v277_v6 = vld [vmem:[%s2577_s2] sm:$0xff]  ;;  %v281_v8 = vld [vmem:[%s2578_s3 + $0x8] sm:$0xff]  ;;  %v497_v34 = vlaneseq }
  0x35   : > { %1810 = vsyncadd (%p2592_p0), [#allocation3], 4294966272  ;;  %372 = vmatprep.mubr.f32.mxu0 %v1834_v0  ;;  %455 = vmatprep.mubr.f32.mxu1 %v1834_v0  ;;  %v280_v7 = vld [vmem:[%s2578_s3] sm:$0xff]  ;;  %v278_v9 = vld [vmem:[%s2577_s2 + $0x8] sm:$0xff]  ;;  %s1836_s29 = smov 112   ;;  %s1837_s10 = smov 1  }
  0x36   : > { %s261_s12 = scalar_select %p260_p5, %s1903_s25, 1  ;;  %1687 = vset.pattern.permute.xlu0 %v1835_v1  ;;  %1688 = vset.pattern.permute.xlu1 %v1835_v1  ;;  %v2034_v35 = vshrl.u32 %v497_v34, 7  ;;  %v2038_v37 = vand.u32 127, %v497_v34  ;;  %v2042_v40 = vld [vmem:[#allocation2 + $0x18] sm:$0xff]  ;;  %v2044_v41 = vld [vmem:[#allocation2 + $0x8] sm:$0xff]  ;;  %v2049_v45 = vld [vmem:[#allocation2] sm:$0xff] }
  0x37   : > { %285 = vperm.xlu0 %1687, %v280_v7   ;;  %290 = vperm.xlu1 %1688, %v281_v8   ;;  %v2051_v48 = vld [vmem:[#allocation2 + $0x10] sm:$0xff]  ;;  %vm881_vm13 = vcmp.gt.f32.partialorder %v2044_v41, 0.5  ;;  %vm880_vm15 = vcmp.gt.f32.partialorder %v2049_v45, 0.5  ;;  %s1840_s11 = smov 126   ;;  %s1841_s13 = smov 14  }
  0x38   : > { %s1621_s9 = sshll.u32 %s261_s12, 5  ;;  %s1838_s12 = smov 127   ;;  %v632_v38 = vsub.s32 4, %v2034_v35  ;;  %v652_v39 = vsub.s32 5, %v2034_v35  ;;  %vm527_vm5 = vcmp.lt.s32.totalorder %v2038_v37, 112  ;;  %v499_v49 = vsub.s32 0, %v2034_v35 }
  0x39   : > { %s264_s14 = scalar_lea.vmem %s2575_s0, %s1621_s9  ;;  %v2068_v63 = vsub.s32 1, %v2034_v35  ;;  %vm564_vm6 = vcmp.lt.s32.totalorder %v2038_v37, 1  ;;  %vm597_vm7 = vcmp.lt.s32.totalorder %v2038_v37, 127  ;;  %s1839_s9 = smov 15   ;;  %vm908_vm12 = vcmp.lt.s32.totalorder %v2038_v37, 15 }
  0x3a   : > { %v266_v2 = vld [vmem:[%s264_s14 + $0x8] sm:$0xff]  ;;  %v268_v3 = vld [vmem:[%s264_s14 + $0x18] sm:$0xff]  ;;  %v265_v4 = vld [vmem:[%s264_s14] sm:$0xff]  ;;  %v645_v42 = vrot.slane %v2042_v40, %v632_v38  ;;  %v665_v43 = vrot.slane %v2042_v40, %v652_v39  ;;  %v633_v51 = vrot.slane %v2049_v45, %v632_v38  ;;  %v637_v52 = vrot.slane %v2044_v41, %v632_v38  ;;  %s1842_s16 = smov 124   ;;  %s1843_s17 = smov 12  }
  0x3b   : > { %308 = vmatprep.subr.mxu0 %v266_v2  ;;  %391 = vmatprep.subr.mxu1 %v268_v3  ;;  %v267_v5 = vld [vmem:[%s264_s14 + $0x10] sm:$0xff]  ;;  %v641_v55 = vrot.slane %v2051_v48, %v632_v38  ;;  %v653_v56 = vrot.slane %v2049_v45, %v652_v39  ;;  %v657_v58 = vrot.slane %v2044_v41, %v652_v39  ;;  %vm882_vm14 = vcmp.gt.f32.partialorder %v2051_v48, 0.5  ;;  %s1844_s18 = smov 120   ;;  %s1845_s19 = smov 8  }
  0x3c   : > { %309 = vmatpush1.msra.mxu0 %v265_v4  ;;  %392 = vmatpush1.msra.mxu1 %v267_v5  ;;  %v661_v59 = vrot.slane %v2051_v48, %v652_v39  ;;  %v504_v62 = vrot.slane %v2044_v41, %v499_v49  ;;  %v500_v3 = vrot.slane %v2049_v45, %v499_v49  ;;  %s1622_s14 = sshll.u32 %s1903_s25, 9  ;;  %p2597_p9 = scmp.ne.s32.totalorder %s2586_s7, 0 }
  0x3d   : > { %1600 = vmatmul.mubr.msk.f32.vlgmr.msra.gmra.mrb[0].mxu0 %vm298_vm0, %v277_v6  ;;  %1603 = vmatmul.mubr.msk.f32.vlgmr.msra.gmra.mrb[0].mxu1 %vm298_vm0, %v277_v6  ;;  %v508_v8 = vrot.slane %v2051_v48, %v499_v49  ;;  %v535_v39 = vrot.slane %v2049_v45, %v2068_v63  ;;  %s1846_s20 = smov [#allocation5]  }
  0x3e   : > { %378 = vmatprep.mubr.f32.mxu0 %v1834_v0  ;;  %461 = vmatprep.mubr.f32.mxu1 %v1834_v0  ;;  %s1767_s26 = sshll.u32 %s1846_s20, 4  ;;  %s1768_s26 = int_to_ptr.vmem [resolvable:$false] %s1767_s26 }
  0x3f   : > { %s1769_s28 = scalar_lea.vmem %s1768_s26, 1024 }
  0x41   : > { %1601 = vmatmul.mubr.msk.f32.gmra.mrb[2].mxu0 %vm298_vm0, %v278_v9  ;;  %1604 = vmatmul.mubr.msk.f32.gmra.mrb[2].mxu1 %vm298_vm0, %v278_v9 }
  0x42   : > { %384 = vmatprep.mubr.f32.mxu0 %v1834_v0  ;;  %467 = vmatprep.mubr.f32.mxu1 %v1834_v0 }
  0xb6   : > { %v286_v10 = vpop.permute.xlu0 %285  ;;  %v2036_v36 = vpop.permute.xlu1 %290 }
 0x110   : > { %v374_v11 = vpop.f32.mrb[0].mxu0  ;;  %v457_v12 = vpop.f32.mrb[0].mxu1 }
 0x111   : > { %v1992_v13 = vadd.f32 %v374_v11, %v286_v10  ;;  %v376_v14 = vpop.f32.mrb[1].mxu0  ;;  %v459_v15 = vpop.f32.mrb[1].mxu1  ;;  %v1996_v17 = vadd.f32 %v457_v12, %v286_v10 }
 0x112   : > { %v1994_v16 = vadd.f32 %v376_v14, %v286_v10  ;;  %v2008_v23 = vadd.f32 %v459_v15, %v286_v10 }
 0x114   : > { %v478_v18 = vadd.f32 %v1994_v16, %v1992_v13  ;;  %v2000_v19 = vpop.f32.mrb[2].mxu0  ;;  %v2002_v20 = vpop.f32.mrb[2].mxu1 }
 0x115   : > { %v2004_v21 = vpop.f32.mrb[3].mxu0  ;;  %v2006_v22 = vpop.f32.mrb[3].mxu1 }
 0x116   : > { %v479_v24 = vadd.f32 %v478_v18, %v1996_v17 }
 0x118   : > { %v480_v25 = vadd.f32 %v479_v24, %v2008_v23  ;;  %v539_v24 = vrot.slane %v2044_v41, %v2068_v63 }
 0x11a   : > { %481 = vadd.xlane.f32.xlu0 %v480_v25  ;;  %v512_v25 = vrot.slane %v2042_v40, %v499_v49 }
 0x1a7   : > { %v482_v26 = vpop.xlane.xlu0 %481 }
 0x1a8   : > { %v484_v27 = vmul.f32 0.001953125, %v482_v26 }
 0x1aa   : > { %vm485_vm1 = vcmp.ge.f32.partialorder %v1992_v13, %v484_v27  ;;  %vm486_vm2 = vcmp.ge.f32.partialorder %v1994_v16, %v484_v27  ;;  %vm487_vm3 = vcmp.ge.f32.partialorder %v1996_v17, %v484_v27  ;;  %vm488_vm4 = vcmp.ge.f32.partialorder %v2008_v23, %v484_v27 }
 0x1ab   : > { %v2017_v28 = vsel %vm485_vm1, 1.0, %v1834_v0  ;;  %v2020_v29 = vsel %vm486_vm2, 1.0, %v1834_v0  ;;  %v2025_v31 = vsel %vm487_vm3, 1.0, %v1834_v0  ;;  %v2028_v32 = vsel %vm488_vm4, 1.0, %v1834_v0 }
 0x1ac   : > { %v1689_v30 = vpack.i.bf16 %v2020_v29, %v2017_v28  ;;  %v1694_v33 = vpack.i.bf16 %v2028_v32, %v2025_v31  ;;  %v649_v53 = vmul.f32 %v2017_v28, %v645_v42  ;;  %v677_v1 = vmul.f32 4.0, %v2028_v32 }
 0x1ad   : > { %v646_v9 = vmul.f32 %v2020_v29, %v633_v51  ;;  %v647_v10 = vmul.f32 %v2025_v31, %v637_v52  ;;  %v648_v12 = vmul.f32 %v2028_v32, %v641_v55  ;;  %v675_v26 = vmul.f32 4.0, %v2020_v29 }
 0x1ae   : > { %1690 = vrot.lane.b32.xlu1 %v1689_v30, %s1836_s29  ;;  %v676_v27 = vmul.f32 4.0, %v2025_v31  ;;  %v674_v38 = vmul.f32 4.0, %v2017_v28  ;;  %v543_v42 = vrot.slane %v2051_v48, %v2068_v63  ;;  %v604_v52 = vsub.s32 3, %v2034_v35 }
 0x1af   : > { %v515_v55 = vmul.f32 %v2020_v29, %v508_v8  ;;  %vm883_vm1 = vcmp.gt.f32.partialorder %v2042_v40, 0.5  ;;  %vm965_vm2 = vcmp.lt.s32.totalorder %v2038_v37, 126  ;;  %vm978_vm3 = vcmp.lt.s32.totalorder %v2038_v37, 14 }
 0x1b0   : > { %v605_v29 = vrot.slane %v2049_v45, %v604_v52  ;;  %v609_v8 = vrot.slane %v2044_v41, %v604_v52  ;;  %vm2585_vm4 = vcmp.lt.s32.totalorder %v2038_v37, 12 }
 0x1b2   : > { %1695 = vrot.lane.b32.xlu1 %v1694_v33, %s1836_s29 }
 0x1b6   : > { %1700 = vrot.lane.b32.xlu1 %v1689_v30, %s1837_s10 }
 0x1ba   : > { %1705 = vrot.lane.b32.xlu1 %v1694_v33, %s1837_s10 }
 0x1be   : > { %1710 = vrot.lane.b32.xlu1 %v1689_v30, %s1838_s12 }
 0x1c2   : > { %1715 = vrot.lane.b32.xlu1 %v1694_v33, %s1838_s12 }
 0x220   : > { %v1691_v44 = vpop.permute.xlu1 %1690 }
 0x221   : > { %v1693_v46 = vunpack.i.h.bf16 %v1691_v44  ;;  %v1692_v47 = vunpack.i.l.bf16 %v1691_v44  ;;  %v571_v44 = vsub.s32 2, %v2034_v35 }
 0x223   : > { %v2056_v50 = vsel %vm527_vm5, %v1692_v47, %v1693_v46 }
 0x224   : > { %v669_v54 = vmul.f32 %v665_v43, %v2056_v50  ;;  %v1696_v57 = vpop.permute.xlu1 %1695  ;;  %v547_v43 = vrot.slane %v2042_v40, %v2068_v63  ;;  %v572_v63 = vrot.slane %v2049_v45, %v571_v44 }
 0x225   : > { %v1698_v60 = vunpack.i.h.bf16 %v1696_v57  ;;  %v1697_v61 = vunpack.i.l.bf16 %v1696_v57  ;;  %v516_v57 = vmul.f32 %v2025_v31, %v512_v25 }
 0x226   : > { %v673_v2 = vadd.f32 %v669_v54, %v649_v53  ;;  %v514_v53 = vmul.f32 %v2017_v28, %v504_v62  ;;  %v513_v54 = vmul.f32 %v2028_v32, %v500_v3  ;;  %v580_v28 = vrot.slane %v2051_v48, %v571_v44 }
 0x227   : > { %v2074_v4 = vsel %vm527_vm5, %v1697_v61, %v1698_v60  ;;  %v529_v5 = vsel %vm527_vm5, %v1693_v46, %v1697_v61  ;;  %v531_v6 = vsel %vm527_vm5, %v1698_v60, %v1692_v47  ;;  %v576_v61 = vrot.slane %v2044_v41, %v571_v44 }
 0x228   : > { %v2080_v7 = vadd.f32 %v677_v1, %v673_v2  ;;  %v1701_v11 = vpop.permute.xlu1 %1700  ;;  %v666_v14 = vmul.f32 %v653_v56, %v529_v5  ;;  %v667_v15 = vmul.f32 %v657_v58, %v2074_v4  ;;  %v668_v18 = vmul.f32 %v661_v59, %v531_v6 }
 0x229   : > { %v1703_v58 = vunpack.i.h.bf16 %v1701_v11  ;;  %v1702_v59 = vunpack.i.l.bf16 %v1701_v11  ;;  %v584_v32 = vrot.slane %v2042_v40, %v571_v44  ;;  %v548_v31 = vmul.f32 %v535_v39, %v531_v6 }
 0x22a   : > { %v670_v30 = vadd.f32 %v666_v14, %v646_v9  ;;  %v671_v33 = vadd.f32 %v667_v15, %v647_v10  ;;  %v672_v34 = vadd.f32 %v668_v18, %v648_v12  ;;  %v613_v11 = vrot.slane %v2051_v48, %v604_v52 }
 0x22b   : > { %v567_v9 = vsel %vm564_vm6, %v1702_v59, %v1703_v58  ;;  %v617_v12 = vrot.slane %v2042_v40, %v604_v52  ;;  %v549_v14 = vmul.f32 %v539_v24, %v2056_v50  ;;  %v550_v15 = vmul.f32 %v543_v42, %v529_v5 }
 0x22c   : > { %v1706_v46 = vpop.permute.xlu1 %1705  ;;  %v678_v47 = vadd.f32 %v674_v38, %v670_v30  ;;  %v2100_v49 = vadd.f32 %v675_v26, %v671_v33  ;;  %v2102_v51 = vadd.f32 %v676_v27, %v672_v34  ;;  %v551_v34 = vmul.f32 %v547_v43, %v2074_v4 }
 0x22d   : > { %v1708_v56 = vunpack.i.h.bf16 %v1706_v46  ;;  %v1707_v60 = vunpack.i.l.bf16 %v1706_v46  ;;  %v552_v38 = vadd.f32 %v548_v31, %v513_v54  ;;  %v586_v39 = vmul.f32 %v576_v61, %v567_v9 }
 0x22e   : > { %v381_v4 = vadd.f32 %v2000_v19, %v2036_v36  ;;  %v553_v43 = vadd.f32 %v549_v14, %v514_v53  ;;  %v554_v54 = vadd.f32 %v550_v15, %v515_v55  ;;  %vm1047_vm5 = vcmp.lt.s32.totalorder %v2038_v37, 124 }
 0x22f   : > { %v568_v2 = vsel %vm564_vm6, %v1708_v56, %v1702_v59  ;;  %v566_v10 = vsel %vm564_vm6, %v1703_v58, %v1707_v60  ;;  %v565_v6 = vsel %vm564_vm6, %v1707_v60, %v1708_v56  ;;  %v555_v60 = vadd.f32 %v551_v34, %v516_v57 }
 0x230   : > { %v1711_v1 = vpop.permute.xlu1 %1710  ;;  %v585_v26 = vmul.f32 %v572_v63, %v568_v2  ;;  %v587_v44 = vmul.f32 %v580_v28, %v566_v10  ;;  %v588_v42 = vmul.f32 %v584_v32, %v565_v6  ;;  %v464_v28 = vadd.f32 %v2002_v20, %v2036_v36 }
 0x231   : > { %v1713_v62 = vunpack.i.h.bf16 %v1711_v1  ;;  %v1712_v3 = vunpack.i.l.bf16 %v1711_v1  ;;  %v474_v53 = vmul.f32 %v381_v4, %v1992_v13 }
 0x233   : > { %v600_v18 = vsel %vm597_vm7, %v1712_v3, %v1713_v62 }
 0x234   : > { %v1716_v25 = vpop.permute.xlu1 %1715  ;;  %v618_v27 = vmul.f32 %v605_v29, %v600_v18  ;;  %v383_v29 = vadd.f32 %v2004_v21, %v2036_v36  ;;  %v476_v21 = vmul.f32 %v464_v28, %v1996_v17 }
 0x235   : > { %v1718_v30 = vunpack.i.h.bf16 %v1716_v25  ;;  %v1717_v33 = vunpack.i.l.bf16 %v1716_v25 }
 0x236   : > { %v622_v46 = vadd.f32 %v618_v27, %v585_v26 }
 0x237   : > { %v598_v50 = vsel %vm597_vm7, %v1717_v33, %v1718_v30  ;;  %v599_v5 = vsel %vm597_vm7, %v1713_v62, %v1717_v33  ;;  %v601_v24 = vsel %vm597_vm7, %v1718_v30, %v1712_v3  ;;  %v466_v62 = vadd.f32 %v2006_v22, %v2036_v36 }
 0x238   : > { %v619_v52 = vmul.f32 %v609_v8, %v599_v5  ;;  %v620_v56 = vmul.f32 %v613_v11, %v598_v50  ;;  %v621_v58 = vmul.f32 %v617_v12, %v601_v24  ;;  %v626_v59 = vadd.f32 %v622_v46, %v552_v38 }
 0x239   : > { %v477_v36 = vmul.f32 %v466_v62, %v2008_v23 }
 0x23a   : > { %v623_v61 = vadd.f32 %v619_v52, %v586_v39  ;;  %v624_v63 = vadd.f32 %v620_v56, %v587_v44  ;;  %v625_v1 = vadd.f32 %v621_v58, %v588_v42  ;;  %v682_v32 = vadd.f32 %v678_v47, %v626_v59 }
 0x23b   : > { %v475_v47 = vmul.f32 %v383_v29, %v1994_v16 }
 0x23c   : > { %v627_v31 = vadd.f32 %v623_v61, %v553_v43  ;;  %v628_v2 = vadd.f32 %v624_v63, %v554_v54  ;;  %v629_v19 = vadd.f32 %v625_v1, %v555_v60  ;;  %vm686_vm8 = vcmp.gt.f32.partialorder %v682_v32, 0.0 }
 0x23d   : > { %v2147_v55 = vsel %vm686_vm8, 1.0, %v1834_v0 }
 0x23e   : > { %v683_v57 = vadd.f32 %v2100_v49, %v627_v31  ;;  %v684_v20 = vadd.f32 %v2102_v51, %v628_v2  ;;  %v685_v3 = vadd.f32 %v2080_v7, %v629_v19  ;;  %v698_v22 = vmul.f32 %v2147_v55, %v474_v53 }
 0x240   : > { %vm687_vm9 = vcmp.gt.f32.partialorder %v683_v57, 0.0  ;;  %vm688_vm10 = vcmp.gt.f32.partialorder %v684_v20, 0.0  ;;  %vm689_vm11 = vcmp.gt.f32.partialorder %v685_v3, 0.0  ;;  %v702_v7 = vrot.slane %v698_v22, 4 }
 0x241   : > { %v2157_v13 = vsel %vm687_vm9, 1.0, %v1834_v0  ;;  %v2160_v49 = vsel %vm688_vm10, 1.0, %v1834_v0  ;;  %v2163_v51 = vsel %vm689_vm11, 1.0, %v1834_v0  ;;  %vm1105_vm11 = vcmp.lt.s32.totalorder %v2038_v37, 120 }
 0x242   : > { %v700_v17 = vmul.f32 %v2160_v49, %v476_v21  ;;  %v699_v16 = vmul.f32 %v2157_v13, %v475_v47  ;;  %v701_v8 = vmul.f32 %v2163_v51, %v477_v36  ;;  %v703_v23 = vadd.f32 %v702_v7, %v698_v22 }
 0x244   : > { %v714_v9 = vrot.slane %v700_v17, 4  ;;  %v708_v10 = vrot.slane %v699_v16, 4  ;;  %v720_v11 = vrot.slane %v701_v8, 4  ;;  %v704_v12 = vrot.slane %v703_v23, 2 }
 0x246   : > { %v715_v14 = vadd.f32 %v714_v9, %v700_v17  ;;  %v709_v15 = vadd.f32 %v708_v10, %v699_v16  ;;  %v721_v6 = vadd.f32 %v720_v11, %v701_v8  ;;  %v705_v18 = vadd.f32 %v704_v12, %v703_v23 }
 0x248   : > { %v716_v25 = vrot.slane %v715_v14, 2  ;;  %v710_v26 = vrot.slane %v709_v15, 2  ;;  %v722_v27 = vrot.slane %v721_v6, 2  ;;  %v706_v30 = vrot.slane %v705_v18, 1 }
 0x24a   : > { %v717_v33 = vadd.f32 %v716_v25, %v715_v14  ;;  %v711_v34 = vadd.f32 %v710_v26, %v709_v15  ;;  %v723_v38 = vadd.f32 %v722_v27, %v721_v6  ;;  %v707_v39 = vadd.f32 %v706_v30, %v705_v18  ;;  %v279_v26 = vld [vmem:[%s2577_s2 + $0x10] sm:$0xff] }
 0x24b   : > { %1602 = vmatmul.mubr.msk.f32.gmra.mrb[4].mxu0 %vm298_vm0, %v279_v26  ;;  %1605 = vmatmul.mubr.msk.f32.gmra.mrb[4].mxu1 %vm298_vm0, %v279_v26  ;;  %v2287_v26 = vld [vmem:[#allocation2 + $0x38] sm:$0x3] }
 0x24c   : > { %v718_v44 = vrot.slane %v717_v33, 1  ;;  %v712_v46 = vrot.slane %v711_v34, 1  ;;  %v2168_v50 = vmul.f32 0.35355338, %v707_v39  ;;  %v724_v5 = vrot.slane %v723_v38, 1  ;;  %802 = vmatprep.mubr.f32.mxu0 %v1834_v0  ;;  %873 = vmatprep.mubr.f32.mxu1 %v1834_v0 }
 0x24d   : > { %vm887_vm10 = vcmp.gt.f32.partialorder %v2287_v26, 0.5 }
 0x24e   : > { %v719_v24 = vadd.f32 %v718_v44, %v717_v33  ;;  %v713_v42 = vadd.f32 %v712_v46, %v711_v34  ;;  %888 = vrot.lane.b32.xlu1 %v2168_v50, %s1838_s12  ;;  %v725_v58 = vadd.f32 %v724_v5, %v723_v38 }
 0x250   : > { %v2172_v52 = vmul.f32 0.35355338, %v719_v24  ;;  %v2174_v56 = vmul.f32 0.35355338, %v713_v42  ;;  %v2180_v4 = vmul.f32 0.35355338, %v725_v58 }
 0x252   : > { %892 = vrot.lane.b32.xlu0 %v2172_v52, %s1838_s12  ;;  %890 = vrot.lane.b32.xlu1 %v2174_v56, %s1838_s12 }
 0x256   : > { %894 = vrot.lane.b32.xlu1 %v2180_v4, %s1838_s12 }
 0x25a   : > { %900 = vrot.lane.b32.xlu1 %v2168_v50, %s1839_s9 }
 0x25e   : > { %902 = vrot.lane.b32.xlu1 %v2174_v56, %s1839_s9 }
 0x262   : > { %904 = vrot.lane.b32.xlu1 %v2172_v52, %s1839_s9 }
 0x266   : > { %906 = vrot.lane.b32.xlu1 %v2180_v4, %s1839_s9 }
 0x2c0   : > { %v889_v43 = vpop.permute.xlu1 %888 }
 0x2c4   : > { %v891_v54 = vpop.permute.xlu1 %890  ;;  %v893_v60 = vpop.permute.xlu0 %892 }
 0x2c5   : > { %v897_v63 = vsel %vm597_vm7, %v891_v54, %v893_v60  ;;  %v898_v53 = vsel %vm597_vm7, %v889_v43, %v891_v54 }
 0x2c6   : > { %v918_v29 = vrot.slane %v897_v63, 2  ;;  %v917_v22 = vrot.slane %v898_v53, 2 }
 0x2c8   : > { %v895_v59 = vpop.permute.xlu1 %894 }
 0x2c9   : > { %v896_v57 = vsel %vm597_vm7, %v893_v60, %v895_v59  ;;  %v899_v20 = vsel %vm597_vm7, %v895_v59, %v889_v43 }
 0x2ca   : > { %v919_v17 = vrot.slane %v896_v57, 2  ;;  %v920_v16 = vrot.slane %v899_v20, 2 }
 0x2cc   : > { %v901_v61 = vpop.permute.xlu1 %900 }
 0x2d0   : > { %v903_v1 = vpop.permute.xlu1 %902 }
 0x2d1   : > { %v911_v28 = vsel %vm908_vm12, %v901_v61, %v903_v1 }
 0x2d2   : > { %v930_v32 = vrot.slane %v911_v28, 2 }
 0x2d4   : > { %v938_v62 = vsel %vm881_vm13, %v918_v29, %v930_v32  ;;  %v905_v31 = vpop.permute.xlu1 %904 }
 0x2d5   : > { %v910_v2 = vsel %vm908_vm12, %v903_v1, %v905_v31  ;;  %v2203_v19 = vmax.f32 %v2174_v56, %v938_v62 }
 0x2d6   : > { %v931_v21 = vrot.slane %v910_v2, 2 }
 0x2d7   : > { %v950_v3 = vrot.slane %v2203_v19, 6 }
 0x2d8   : > { %v907_v47 = vpop.permute.xlu1 %906  ;;  %v939_v9 = vsel %vm882_vm14, %v919_v17, %v931_v21 }
 0x2d9   : > { %v909_v36 = vsel %vm908_vm12, %v905_v31, %v907_v47  ;;  %v912_v7 = vsel %vm908_vm12, %v907_v47, %v901_v61  ;;  %959 = vrot.lane.b32.xlu0 %v950_v3, %s1840_s11  ;;  %v943_v18 = vmax.f32 %v2172_v52, %v939_v9 }
 0x2da   : > { %v929_v8 = vrot.slane %v912_v7, 2  ;;  %v932_v23 = vrot.slane %v909_v36, 2 }
 0x2db   : > { %v951_v25 = vrot.slane %v943_v18, 6 }
 0x2dc   : > { %v937_v10 = vsel %vm880_vm15, %v917_v22, %v929_v8  ;;  %v940_v11 = vsel %vm883_vm1, %v920_v16, %v932_v23 }
 0x2dd   : > { %v941_v12 = vmax.f32 %v2168_v50, %v937_v10  ;;  %v944_v14 = vmax.f32 %v2180_v4, %v940_v11 }
 0x2df   : > { %v949_v15 = vrot.slane %v941_v12, 6  ;;  %v952_v6 = vrot.slane %v944_v14, 6 }
 0x2e1   : > { %957 = vrot.lane.b32.xlu1 %v949_v15, %s1840_s11  ;;  %963 = vrot.lane.b32.xlu0 %v952_v6, %s1840_s11 }
 0x2e5   : > { %961 = vrot.lane.b32.xlu1 %v951_v25, %s1840_s11  ;;  %972 = vrot.lane.b32.xlu0 %v950_v3, %s1841_s13 }
 0x2e9   : > { %970 = vrot.lane.b32.xlu1 %v949_v15, %s1841_s13  ;;  %976 = vrot.lane.b32.xlu0 %v952_v6, %s1841_s13 }
 0x2ed   : > { %974 = vrot.lane.b32.xlu1 %v951_v25, %s1841_s13  ;;  %v2285_v25 = vld [vmem:[#allocation2 + $0x20] sm:$0x3] }
 0x2ee   : > { %vm884_vm9 = vcmp.gt.f32.partialorder %v2285_v25, 0.5 }
 0x34b   : > { %v960_v27 = vpop.permute.xlu0 %959 }
 0x353   : > { %v958_v30 = vpop.permute.xlu1 %957  ;;  %v964_v33 = vpop.permute.xlu0 %963 }
 0x354   : > { %v968_v39 = vsel %vm965_vm2, %v958_v30, %v960_v27  ;;  %v969_v59 = vsel %vm965_vm2, %v964_v33, %v958_v30 }
 0x355   : > { %v987_v42 = vrot.slane %v968_v39, 1  ;;  %v990_v31 = vrot.slane %v969_v59, 1 }
 0x357   : > { %v962_v34 = vpop.permute.xlu1 %961  ;;  %v973_v38 = vpop.permute.xlu0 %972 }
 0x358   : > { %v967_v44 = vsel %vm965_vm2, %v960_v27, %v962_v34  ;;  %v966_v60 = vsel %vm965_vm2, %v962_v34, %v964_v33 }
 0x359   : > { %v988_v58 = vrot.slane %v967_v44, 1  ;;  %v989_v2 = vrot.slane %v966_v60, 1 }
 0x35b   : > { %v971_v46 = vpop.permute.xlu1 %970  ;;  %v977_v5 = vpop.permute.xlu0 %976 }
 0x35c   : > { %v981_v0 = vsel %vm978_vm3, %v971_v46, %v973_v38  ;;  %v982_v24 = vsel %vm978_vm3, %v977_v5, %v971_v46 }
 0x35d   : > { %v1000_v43 = vrot.slane %v981_v0, 1  ;;  %v999_v54 = vrot.slane %v982_v24, 1 }
 0x35f   : > { %v1008_v61 = vsel %vm881_vm13, %v988_v58, %v1000_v43  ;;  %v1007_v63 = vsel %vm880_vm15, %v987_v42, %v999_v54  ;;  %v975_v1 = vpop.permute.xlu1 %974 }
 0x360   : > { %v1016_v28 = vrot.slane %v1008_v61, 1  ;;  %v1015_v29 = vrot.slane %v1007_v63, 1  ;;  %v979_v32 = vsel %vm978_vm3, %v975_v1, %v977_v5  ;;  %v980_v62 = vsel %vm978_vm3, %v973_v38, %v975_v1 }
 0x361   : > { %v1001_v53 = vrot.slane %v980_v62, 1  ;;  %v1002_v57 = vrot.slane %v979_v32, 1 }
 0x362   : > { %v1024_v20 = vmax.f32 %v2203_v19, %v1016_v28  ;;  %v1023_v3 = vmax.f32 %v941_v12, %v1015_v29 }
 0x363   : > { %v1009_v21 = vsel %vm882_vm14, %v989_v2, %v1001_v53  ;;  %v1010_v47 = vsel %vm883_vm1, %v990_v31, %v1002_v57  ;;  %v386_v53 = vpop.f32.mrb[4].mxu0  ;;  %v469_v57 = vpop.f32.mrb[4].mxu1 }
 0x364   : > { %v1017_v22 = vrot.slane %v1009_v21, 1  ;;  %v1018_v36 = vrot.slane %v1010_v47, 1  ;;  %v1032_v7 = vrot.slane %v1024_v20, 6  ;;  %v1031_v17 = vrot.slane %v1023_v3, 6  ;;  %v471_v21 = vpop.f32.mrb[5].mxu1 }
 0x366   : > { %1041 = vrot.lane.b32.xlu0 %v1032_v7, %s1842_s16  ;;  %1039 = vrot.lane.b32.xlu1 %v1031_v17, %s1842_s16  ;;  %v1025_v16 = vmax.f32 %v943_v18, %v1017_v22  ;;  %v1026_v8 = vmax.f32 %v944_v14, %v1018_v36  ;;  %v2278_v14 = vld [vmem:[#allocation2 + $0x28] sm:$0x3]  ;;  %v2283_v18 = vld [vmem:[#allocation2 + $0x30] sm:$0x3] }
 0x367   : > { %vm885_vm6 = vcmp.gt.f32.partialorder %v2278_v14, 0.5  ;;  %vm886_vm8 = vcmp.gt.f32.partialorder %v2283_v18, 0.5 }
 0x368   : > { %v1033_v23 = vrot.slane %v1025_v16, 6  ;;  %v1034_v19 = vrot.slane %v1026_v8, 6 }
 0x36a   : > { %1043 = vrot.lane.b32.xlu1 %v1033_v23, %s1842_s16  ;;  %1045 = vrot.lane.b32.xlu0 %v1034_v19, %s1842_s16 }
 0x36e   : > { %1052 = vrot.lane.b32.xlu1 %v1031_v17, %s1843_s17  ;;  %1054 = vrot.lane.b32.xlu0 %v1032_v7, %s1843_s17 }
 0x372   : > { %1056 = vrot.lane.b32.xlu1 %v1033_v23, %s1843_s17  ;;  %1058 = vrot.lane.b32.xlu0 %v1034_v19, %s1843_s17 }
 0x3d8   : > { %v1040_v9 = vpop.permute.xlu1 %1039  ;;  %v1042_v10 = vpop.permute.xlu0 %1041 }
 0x3d9   : > { %v1050_v38 = vsel %vm1047_vm5, %v1040_v9, %v1042_v10 }
 0x3dc   : > { %v1044_v11 = vpop.permute.xlu1 %1043  ;;  %v1046_v12 = vpop.permute.xlu0 %1045 }
 0x3dd   : > { %v1049_v27 = vsel %vm1047_vm5, %v1042_v10, %v1044_v11  ;;  %v1048_v39 = vsel %vm1047_vm5, %v1044_v11, %v1046_v12  ;;  %v1051_v44 = vsel %vm1047_vm5, %v1046_v12, %v1040_v9 }
 0x3e0   : > { %v1053_v15 = vpop.permute.xlu1 %1052  ;;  %v1055_v6 = vpop.permute.xlu0 %1054 }
 0x3e1   : > { %v1063_v30 = vsel %vm2585_vm4, %v1053_v15, %v1055_v6 }
 0x3e2   : > { %v1066_v33 = vsel %vm885_vm6, %v1049_v27, %v1063_v30 }
 0x3e3   : > { %v1074_v34 = vrot.slane %v1066_v33, 2 }
 0x3e4   : > { %v1057_v46 = vpop.permute.xlu1 %1056  ;;  %v1059_v5 = vpop.permute.xlu0 %1058 }
 0x3e5   : > { %v1062_v0 = vsel %vm2585_vm4, %v1055_v6, %v1057_v46  ;;  %v1061_v24 = vsel %vm2585_vm4, %v1057_v46, %v1059_v5  ;;  %v1064_v42 = vsel %vm2585_vm4, %v1059_v5, %v1053_v15  ;;  %v1082_v58 = vmax.f32 %v1024_v20, %v1074_v34  ;;  %v282_v20 = vld [vmem:[%s2578_s3 + $0x10] sm:$0xff] }
 0x3e6   : > { %v1067_v43 = vsel %vm886_vm8, %v1048_v39, %v1062_v0  ;;  %v1065_v54 = vsel %vm884_vm9, %v1050_v38, %v1064_v42  ;;  %v1068_v59 = vsel %vm887_vm10, %v1051_v44, %v1061_v24  ;;  %vm1118_vm4 = vcmp.lt.s32.totalorder %v2038_v37, 8 }
 0x3e7   : > { %v1075_v60 = vrot.slane %v1067_v43, 2  ;;  %v1073_v61 = vrot.slane %v1065_v54, 2  ;;  %v1076_v63 = vrot.slane %v1068_v59, 2  ;;  %v1090_v1 = vrot.slane %v1082_v58, 6 }
 0x3e9   : > { %1099 = vrot.lane.b32.xlu0 %v1090_v1, %s1844_s18  ;;  %v1081_v28 = vmax.f32 %v1023_v3, %v1073_v61  ;;  %v1084_v29 = vmax.f32 %v1026_v8, %v1076_v63  ;;  %v1083_v31 = vmax.f32 %v1025_v16, %v1075_v60  ;;  %v388_v3 = vpop.f32.mrb[5].mxu0 }
 0x3eb   : > { %v1089_v32 = vrot.slane %v1081_v28, 6  ;;  %v1092_v62 = vrot.slane %v1084_v29, 6  ;;  %v1091_v2 = vrot.slane %v1083_v31, 6 }
 0x3ed   : > { %1097 = vrot.lane.b32.xlu1 %v1089_v32, %s1844_s18  ;;  %1103 = vrot.lane.b32.xlu0 %v1092_v62, %s1844_s18 }
 0x3f1   : > { %1101 = vrot.lane.b32.xlu1 %v1091_v2, %s1844_s18  ;;  %1112 = vrot.lane.b32.xlu0 %v1090_v1, %s1845_s19 }
 0x3f5   : > { %1110 = vrot.lane.b32.xlu1 %v1089_v32, %s1845_s19  ;;  %1116 = vrot.lane.b32.xlu0 %v1092_v62, %s1845_s19 }
 0x3f9   : > { %1114 = vrot.lane.b32.xlu1 %v1091_v2, %s1845_s19 }
 0x3fd   : > { %295 = vperm.xlu1 %1688, %v282_v20  }
 0x45b   : > { %v1100_v47 = vpop.permute.xlu0 %1099 }
 0x45f   : > { %v1098_v22 = vpop.permute.xlu1 %1097  ;;  %v1104_v36 = vpop.permute.xlu0 %1103 }
 0x460   : > { %v1108_v16 = vsel %vm1105_vm11, %v1098_v22, %v1100_v47  ;;  %v1109_v27 = vsel %vm1105_vm11, %v1104_v36, %v1098_v22 }
 0x461   : > { %v1127_v11 = vrot.slane %v1108_v16, 7  ;;  %v1130_v0 = vrot.slane %v1109_v27, 7 }
 0x463   : > { %v1102_v7 = vpop.permute.xlu1 %1101  ;;  %v1113_v17 = vpop.permute.xlu0 %1112 }
 0x464   : > { %v1107_v8 = vsel %vm1105_vm11, %v1100_v47, %v1102_v7  ;;  %v1106_v30 = vsel %vm1105_vm11, %v1102_v7, %v1104_v36 }
 0x465   : > { %v1128_v12 = vrot.slane %v1107_v8, 7  ;;  %v1129_v24 = vrot.slane %v1106_v30, 7 }
 0x467   : > { %v1111_v23 = vpop.permute.xlu1 %1110  ;;  %v1117_v19 = vpop.permute.xlu0 %1116 }
 0x468   : > { %v1121_v9 = vsel %vm1118_vm4, %v1111_v23, %v1113_v17  ;;  %v1122_v10 = vsel %vm1118_vm4, %v1117_v19, %v1111_v23 }
 0x469   : > { %v1140_v15 = vrot.slane %v1121_v9, 7  ;;  %v1139_v6 = vrot.slane %v1122_v10, 7 }
 0x46b   : > { %v1148_v33 = vsel %vm885_vm6, %v1128_v12, %v1140_v15  ;;  %v1147_v34 = vsel %vm884_vm9, %v1127_v11, %v1139_v6  ;;  %v1115_v38 = vpop.permute.xlu1 %1114 }
 0x46c   : > { %v1156_v39 = vrot.slane %v1148_v33, 3  ;;  %v1155_v44 = vrot.slane %v1147_v34, 3  ;;  %v1119_v46 = vsel %vm1118_vm4, %v1115_v38, %v1117_v19  ;;  %v1120_v5 = vsel %vm1118_vm4, %v1113_v17, %v1115_v38 }
 0x46d   : > { %v1141_v42 = vrot.slane %v1120_v5, 7  ;;  %v1142_v43 = vrot.slane %v1119_v46, 7 }
 0x46e   : > { %v1164_v54 = vmax.f32 %v1082_v58, %v1156_v39  ;;  %v1163_v59 = vmax.f32 %v1081_v28, %v1155_v44 }
 0x46f   : > { %v1149_v60 = vsel %vm886_vm8, %v1129_v24, %v1141_v42  ;;  %v1150_v61 = vsel %vm887_vm10, %v1130_v0, %v1142_v43 }
 0x470   : > { %v1168_v63 = vsub.f32 %v2174_v56, %v1164_v54  ;;  %v1167_v1 = vsub.f32 %v2168_v50, %v1163_v59  ;;  %v1157_v32 = vrot.slane %v1149_v60, 3  ;;  %v1158_v62 = vrot.slane %v1150_v61, 3 }
 0x472   : > { %v1173_v2 = vmul.f32 1.442695, %v1168_v63  ;;  %v1171_v20 = vmul.f32 1.442695, %v1167_v1  ;;  %v1165_v47 = vmax.f32 %v1083_v31, %v1157_v32  ;;  %v1166_v22 = vmax.f32 %v1084_v29, %v1158_v62 }
 0x474   : > { %1719 = vpow2.f32 %v1173_v2  ;;  %v1169_v58 = vsub.f32 %v2172_v52, %v1165_v47  ;;  %v1170_v28 = vsub.f32 %v2180_v4, %v1166_v22 }
 0x475   : > { %1721 = vpow2.f32 %v1171_v20 }
 0x476   : > { %v1175_v36 = vmul.f32 1.442695, %v1169_v58  ;;  %v1177_v7 = vmul.f32 1.442695, %v1170_v28 }
 0x478   : > { %1723 = vpow2.f32 %v1175_v36 }
 0x479   : > { %1725 = vpow2.f32 %v1177_v7  ;;  %v734_v7 = vld [vmem:[%s2579_s4] sm:$0xff] }
 0x47c   : > { %v296_v17 = vpop.permute.xlu1 %295 }
 0x47d   : > { %v387_v56 = vadd.f32 %v386_v53, %v296_v17  ;;  %v389_v16 = vadd.f32 %v388_v3, %v296_v17  ;;  %v470_v50 = vadd.f32 %v469_v57, %v296_v17  ;;  %v472_v8 = vadd.f32 %v471_v21, %v296_v17 }
 0x47e   : > { %v2357_v23 = vpop.eup %1719 }
 0x47f   : > { %v2359_v19 = vpop.eup %1721  ;;  %v731_v29 = vmul.f32 %v2157_v13, %v389_v16  ;;  %v733_v52 = vmul.f32 %v2163_v51, %v472_v8  ;;  %v1184_v4 = vrot.slane %v2357_v23, 6  ;;  %v730_v31 = vmul.f32 %v2147_v55, %v387_v56 }
 0x480   : > { %v1183_v9 = vrot.slane %v2359_v19, 6  ;;  %v732_v10 = vmul.f32 %v2160_v49, %v470_v50 }
 0x481   : > { %738 = vmatprep.subr.mxu0 %v731_v29  ;;  %809 = vmatprep.subr.mxu1 %v733_v52 }
 0x482   : > { %v2367_v53 = vpop.eup %1723  ;;  %1193 = vrot.lane.b32.xlu1 %v1184_v4, %s1838_s12  ;;  %1191 = vrot.lane.b32.xlu0 %v1183_v9, %s1838_s12 }
 0x483   : > { %v2371_v57 = vpop.eup %1725  ;;  %739 = vmatpush1.msra.mxu0 %v730_v31  ;;  %810 = vmatpush1.msra.mxu1 %v732_v10  ;;  %v1185_v13 = vrot.slane %v2367_v53, 6 }
 0x484   : > { %v1186_v55 = vrot.slane %v2371_v57, 6  ;;  %1614 = vmatmul.mubr.msk.f32.vlgmr.msra.gmra.mrb[6].mxu0 %vm298_vm0, %v734_v7  ;;  %1615 = vmatmul.mubr.msk.f32.vlgmr.msra.gmra.mrb[6].mxu1 %vm298_vm0, %v734_v7  ;;  %vm2593_vm0 = vcmp.lt.s32.totalorder %v2038_v37, 12 }
 0x486   : > { %1195 = vrot.lane.b32.xlu0 %v1185_v13, %s1838_s12  ;;  %1197 = vrot.lane.b32.xlu1 %v1186_v55, %s1838_s12 }
 0x48a   : > { %1203 = vrot.lane.b32.xlu0 %v1183_v9, %s1839_s9  ;;  %1205 = vrot.lane.b32.xlu1 %v1184_v4, %s1839_s9 }
 0x48e   : > { %1207 = vrot.lane.b32.xlu0 %v1185_v13, %s1839_s9  ;;  %1209 = vrot.lane.b32.xlu1 %v1186_v55, %s1839_s9  ;;  %s257_s9 = sand.u32 1, %s1821_s22  }
 0x48f   : > { %s1506_s25 = scalar_lea.sflag [#allocation4], %s257_s9 }
 0x4f4   : > { %v1194_v49 = vpop.permute.xlu1 %1193  ;;  %v1192_v51 = vpop.permute.xlu0 %1191 }
 0x4f5   : > { %v1201_v6 = vsel %vm597_vm7, %v1192_v51, %v1194_v49 }
 0x4f6   : > { %v1219_v39 = vrot.slane %v1201_v6, 2 }
 0x4f8   : > { %v1196_v3 = vpop.permute.xlu0 %1195  ;;  %v1198_v21 = vpop.permute.xlu1 %1197 }
 0x4f9   : > { %v1200_v11 = vsel %vm597_vm7, %v1194_v49, %v1196_v3  ;;  %v1199_v27 = vsel %vm597_vm7, %v1196_v3, %v1198_v21  ;;  %v1202_v38 = vsel %vm597_vm7, %v1198_v21, %v1192_v51  ;;  %vm2594_vm7 = vmmov %vm2593_vm0 }
 0x4fa   : > { %v1220_v33 = vrot.slane %v1200_v11, 2  ;;  %v1221_v44 = vrot.slane %v1199_v27, 2  ;;  %v1222_v59 = vrot.slane %v1202_v38, 2 }
 0x4fc   : > { %v1204_v12 = vpop.permute.xlu0 %1203  ;;  %v1206_v15 = vpop.permute.xlu1 %1205 }
 0x4fd   : > { %v1213_v30 = vsel %vm908_vm12, %v1204_v12, %v1206_v15 }
 0x4fe   : > { %v1232_v34 = vrot.slane %v1213_v30, 2 }
 0x500   : > { %v1240_v46 = vsel %vm881_vm13, %v1220_v33, %v1232_v34  ;;  %v1208_v5 = vpop.permute.xlu0 %1207  ;;  %v1210_v0 = vpop.permute.xlu1 %1209 }
 0x501   : > { %v1212_v24 = vsel %vm908_vm12, %v1206_v15, %v1208_v5  ;;  %v1211_v42 = vsel %vm908_vm12, %v1208_v5, %v1210_v0  ;;  %v1214_v43 = vsel %vm908_vm12, %v1210_v0, %v1204_v12  ;;  %v1244_v54 = vadd.f32 %v2357_v23, %v1240_v46  ;;  %vm2595_vm12 = vmmov %vm2593_vm0 }
 0x502   : > { %v1233_v60 = vrot.slane %v1212_v24, 2  ;;  %v1231_v61 = vrot.slane %v1214_v43, 2  ;;  %v1234_v63 = vrot.slane %v1211_v42, 2 }
 0x503   : > { %v1252_v1 = vrot.slane %v1244_v54, 6 }
 0x504   : > { %v1241_v32 = vsel %vm882_vm14, %v1221_v44, %v1233_v60  ;;  %v1239_v62 = vsel %vm880_vm15, %v1219_v39, %v1231_v61  ;;  %v1242_v2 = vsel %vm883_vm1, %v1222_v59, %v1234_v63 }
 0x505   : > { %1261 = vrot.lane.b32.xlu1 %v1252_v1, %s1840_s11  ;;  %v1243_v20 = vadd.f32 %v2359_v19, %v1239_v62  ;;  %v1246_v47 = vadd.f32 %v2371_v57, %v1242_v2  ;;  %v1245_v28 = vadd.f32 %v2367_v53, %v1241_v32 }
 0x507   : > { %v1251_v22 = vrot.slane %v1243_v20, 6  ;;  %v1254_v58 = vrot.slane %v1246_v47, 6  ;;  %v1253_v36 = vrot.slane %v1245_v28, 6 }
 0x509   : > { %1259 = vrot.lane.b32.xlu0 %v1251_v22, %s1840_s11  ;;  %1265 = vrot.lane.b32.xlu1 %v1254_v58, %s1840_s11 }
 0x50d   : > { %1263 = vrot.lane.b32.xlu0 %v1253_v36, %s1840_s11  ;;  %1273 = vrot.lane.b32.xlu1 %v1252_v1, %s1841_s13  ;;  %s1597_s11 = sshll.u32 %s257_s9, 5 }
 0x511   : > { %1271 = vrot.lane.b32.xlu0 %v1251_v22, %s1841_s13  ;;  %1277 = vrot.lane.b32.xlu1 %v1254_v58, %s1841_s13 }
 0x515   : > { %1275 = vrot.lane.b32.xlu0 %v1253_v36, %s1841_s13  ;;  %s259_s13 = scalar_lea.vmem [#allocation5], %s1597_s11 }
 0x516   : > { %s1520_s15 = sshll.u32 %s259_s13, 4  ;;  %s2533_s15 = int_to_ptr.vmem [resolvable:$true] %s1520_s15 }
 0x517   : > { %p1770_p2 = scmp.lt.s32.totalorder %s2533_s15, %s1768_s26 }
 0x577   : > { %v1262_v17 = vpop.permute.xlu1 %1261 }
 0x57b   : > { %v1260_v56 = vpop.permute.xlu0 %1259  ;;  %v1266_v16 = vpop.permute.xlu1 %1265 }
 0x57c   : > { %v1269_v29 = vsel %vm965_vm2, %v1260_v56, %v1262_v17  ;;  %v1270_v3 = vsel %vm965_vm2, %v1266_v16, %v1260_v56 }
 0x57d   : > { %v1287_v13 = vrot.slane %v1269_v29, 1  ;;  %v1290_v34 = vrot.slane %v1270_v3, 1 }
 0x57f   : > { %v1264_v50 = vpop.permute.xlu0 %1263  ;;  %v1274_v8 = vpop.permute.xlu1 %1273 }
 0x580   : > { %v1268_v52 = vsel %vm965_vm2, %v1262_v17, %v1264_v50  ;;  %v1267_v21 = vsel %vm965_vm2, %v1264_v50, %v1266_v16 }
 0x581   : > { %v1288_v55 = vrot.slane %v1268_v52, 1  ;;  %v1289_v38 = vrot.slane %v1267_v21, 1 }
 0x583   : > { %v1272_v4 = vpop.permute.xlu0 %1271  ;;  %v1278_v31 = vpop.permute.xlu1 %1277 }
 0x584   : > { %v1281_v9 = vsel %vm978_vm3, %v1272_v4, %v1274_v8  ;;  %v1282_v10 = vsel %vm978_vm3, %v1278_v31, %v1272_v4 }
 0x585   : > { %v1300_v49 = vrot.slane %v1281_v9, 1  ;;  %v1299_v51 = vrot.slane %v1282_v10, 1 }
 0x587   : > { %v1308_v11 = vsel %vm881_vm13, %v1288_v55, %v1300_v49  ;;  %v1307_v12 = vsel %vm880_vm15, %v1287_v13, %v1299_v51  ;;  %v1276_v15 = vpop.permute.xlu0 %1275  ;;  %vm2596_vm13 = vmmov %vm2593_vm0 }
 0x588   : > { %v1316_v6 = vrot.slane %v1308_v11, 1  ;;  %v1315_v27 = vrot.slane %v1307_v12, 1  ;;  %v1279_v30 = vsel %vm978_vm3, %v1276_v15, %v1278_v31  ;;  %v1280_v33 = vsel %vm978_vm3, %v1274_v8, %v1276_v15  ;;  %v1491_v12 = vld [vmem:[%s2580_s5] sm:$0xff]  ;;  %v804_v15 = vpop.f32.mrb[6].mxu0 }
 0x589   : > { %v1301_v39 = vrot.slane %v1280_v33, 1  ;;  %v1302_v44 = vrot.slane %v1279_v30, 1 }
 0x58a   : > { %v1324_v46 = vadd.f32 %v1316_v6, %v1244_v54  ;;  %v1323_v5 = vadd.f32 %v1315_v27, %v1243_v20  ;;  %v806_v6 = vpop.f32.mrb[7].mxu0  ;;  %v2489_v27 = vpop.f32.mrb[6].mxu1 }
 0x58b   : > { %v1309_v41 = vsel %vm882_vm14, %v1289_v38, %v1301_v39  ;;  %v1310_v45 = vsel %vm883_vm1, %v1290_v34, %v1302_v44  ;;  %v2491_v30 = vpop.f32.mrb[7].mxu1 }
 0x58c   : > { %v1317_v0 = vrot.slane %v1309_v41, 1  ;;  %v1318_v24 = vrot.slane %v1310_v45, 1  ;;  %v1332_v42 = vrot.slane %v1324_v46, 6  ;;  %v1331_v43 = vrot.slane %v1323_v5, 6 }
 0x58e   : > { %1341 = vrot.lane.b32.xlu1 %v1332_v42, %s1842_s16  ;;  %1339 = vrot.lane.b32.xlu0 %v1331_v43, %s1842_s16  ;;  %v1325_v59 = vadd.f32 %v1317_v0, %v1245_v28  ;;  %v1326_v60 = vadd.f32 %v1318_v24, %v1246_v47 }
 0x590   : > { %v1333_v61 = vrot.slane %v1325_v59, 6  ;;  %v1334_v63 = vrot.slane %v1326_v60, 6 }
 0x592   : > { %1343 = vrot.lane.b32.xlu0 %v1333_v61, %s1842_s16  ;;  %1345 = vrot.lane.b32.xlu1 %v1334_v63, %s1842_s16 }
 0x596   : > { %1351 = vrot.lane.b32.xlu0 %v1331_v43, %s1843_s17  ;;  %1353 = vrot.lane.b32.xlu1 %v1332_v42, %s1843_s17 }
 0x59a   : > { %1355 = vrot.lane.b32.xlu0 %v1333_v61, %s1843_s17  ;;  %1357 = vrot.lane.b32.xlu1 %v1334_v63, %s1843_s17 }
 0x600   : > { %v1340_v40 = vpop.permute.xlu0 %1339  ;;  %v1342_v48 = vpop.permute.xlu1 %1341 }
 0x601   : > { %v1349_v58 = vsel %vm1047_vm5, %v1340_v40, %v1342_v48 }
 0x604   : > { %v1344_v54 = vpop.permute.xlu0 %1343  ;;  %v1346_v1 = vpop.permute.xlu1 %1345 }
 0x605   : > { %v1348_v2 = vsel %vm1047_vm5, %v1342_v48, %v1344_v54  ;;  %v1347_v28 = vsel %vm1047_vm5, %v1344_v54, %v1346_v1  ;;  %v1350_v36 = vsel %vm1047_vm5, %v1346_v1, %v1340_v40 }
 0x608   : > { %v1352_v32 = vpop.permute.xlu0 %1351  ;;  %v1354_v62 = vpop.permute.xlu1 %1353 }
 0x609   : > { %v1361_v20 = vsel %vm2593_vm0, %v1352_v32, %v1354_v62 }
 0x60a   : > { %v1364_v47 = vsel %vm885_vm6, %v1348_v2, %v1361_v20 }
 0x60b   : > { %v1372_v22 = vrot.slane %v1364_v47, 2 }
 0x60c   : > { %v1356_v7 = vpop.permute.xlu0 %1355  ;;  %v1358_v17 = vpop.permute.xlu1 %1357 }
 0x60d   : > { %v1360_v56 = vsel %vm2594_vm7, %v1354_v62, %v1356_v7  ;;  %v1359_v16 = vsel %vm2595_vm12, %v1356_v7, %v1358_v17  ;;  %v1362_v50 = vsel %vm2596_vm13, %v1358_v17, %v1352_v32  ;;  %v1380_v8 = vadd.f32 %v1372_v22, %v1324_v46 }
 0x60e   : > { %v1365_v29 = vsel %vm886_vm8, %v1347_v28, %v1360_v56  ;;  %v1363_v52 = vsel %vm884_vm9, %v1349_v58, %v1362_v50  ;;  %v1366_v4 = vsel %vm887_vm10, %v1350_v36, %v1359_v16  ;;  %v1473_v16 = vsub.s32 6, %v2034_v35 }
 0x60f   : > { %v1373_v31 = vrot.slane %v1365_v29, 2  ;;  %v1371_v9 = vrot.slane %v1363_v52, 2  ;;  %v1374_v10 = vrot.slane %v1366_v4, 2  ;;  %v1388_v13 = vrot.slane %v1380_v8, 6 }
 0x611   : > { %1397 = vrot.lane.b32.xlu1 %v1388_v13, %s1844_s18  ;;  %v1379_v55 = vadd.f32 %v1371_v9, %v1323_v5  ;;  %v1382_v49 = vadd.f32 %v1374_v10, %v1326_v60  ;;  %v1381_v21 = vadd.f32 %v1373_v31, %v1325_v59 }
 0x613   : > { %v1387_v51 = vrot.slane %v1379_v55, 6  ;;  %v1390_v3 = vrot.slane %v1382_v49, 6  ;;  %v1389_v11 = vrot.slane %v1381_v21, 6 }
 0x615   : > { %1395 = vrot.lane.b32.xlu0 %v1387_v51, %s1844_s18  ;;  %1401 = vrot.lane.b32.xlu1 %v1390_v3, %s1844_s18 }
 0x619   : > { %1399 = vrot.lane.b32.xlu0 %v1389_v11, %s1844_s18  ;;  %1409 = vrot.lane.b32.xlu1 %v1388_v13, %s1845_s19  ;;  %s2531_s18 = scalar_lea.hbm %s2581_s6, %s1622_s14 }
 0x61d   : > { %1407 = vrot.lane.b32.xlu0 %v1387_v51, %s1845_s19  ;;  %1413 = vrot.lane.b32.xlu1 %v1390_v3, %s1845_s19 }
 0x621   : > { %1411 = vrot.lane.b32.xlu0 %v1389_v11, %s1845_s19  ;;  %s1763_s19 = scalar_lea.vmem %s2533_s15, 512 }
 0x622   : > { %p1764_p6 = scmp.ne.s32.totalorder %s2533_s15, %s1763_s19  ;;  %p1771_p3 = scmp.lt.s32.totalorder %s1769_s28, %s1763_s19 }
 0x624   : > { %p1765_p10 = pnand %p1764_p6, %p2597_p9  ;;  %p1772_p4 = por %p1771_p3, %p1770_p2 }
 0x625   : > { %1494 = vperm.xlu0 %1687, %v1491_v12  }
 0x626   : > { %p1766_p12 = pneg %p1765_p10 }
 0x628   : > { %p1773_p7 = pnand %p1772_p4, %p1766_p12 }
 0x683   : > { %v1398_v33 = vpop.permute.xlu1 %1397 }
 0x687   : > { %v1396_v34 = vpop.permute.xlu0 %1395  ;;  %v1402_v38 = vpop.permute.xlu1 %1401 }
 0x688   : > { %v1405_v46 = vsel %vm1105_vm11, %v1396_v34, %v1398_v33  ;;  %v1406_v61 = vsel %vm1105_vm11, %v1402_v38, %v1396_v34 }
 0x689   : > { %v1423_v42 = vrot.slane %v1405_v46, 7  ;;  %v1426_v20 = vrot.slane %v1406_v61, 7 }
 0x68b   : > { %v1400_v39 = vpop.permute.xlu0 %1399  ;;  %v1410_v44 = vpop.permute.xlu1 %1409 }
 0x68c   : > { %v1404_v5 = vsel %vm1105_vm11, %v1398_v33, %v1400_v39  ;;  %v1403_v63 = vsel %vm1105_vm11, %v1400_v39, %v1402_v38 }
 0x68d   : > { %v1424_v43 = vrot.slane %v1404_v5, 7  ;;  %v1425_v47 = vrot.slane %v1403_v63, 7 }
 0x68f   : > { %v1408_v41 = vpop.permute.xlu0 %1407  ;;  %v1414_v45 = vpop.permute.xlu1 %1413 }
 0x690   : > { %v1417_v0 = vsel %vm1118_vm4, %v1408_v41, %v1410_v44  ;;  %v1418_v24 = vsel %vm1118_vm4, %v1414_v45, %v1408_v41 }
 0x691   : > { %v1436_v59 = vrot.slane %v1417_v0, 7  ;;  %v1435_v60 = vrot.slane %v1418_v24, 7 }
 0x693   : > { %v1444_v40 = vsel %vm885_vm6, %v1424_v43, %v1436_v59  ;;  %v1443_v48 = vsel %vm884_vm9, %v1423_v42, %v1435_v60  ;;  %v1412_v54 = vpop.permute.xlu0 %1411 }
 0x694   : > { %v1452_v1 = vrot.slane %v1444_v40, 3  ;;  %v1451_v32 = vrot.slane %v1443_v48, 3  ;;  %v1415_v62 = vsel %vm1118_vm4, %v1412_v54, %v1414_v45  ;;  %v1416_v2 = vsel %vm1118_vm4, %v1410_v44, %v1412_v54 }
 0x695   : > { %v1437_v22 = vrot.slane %v1416_v2, 7  ;;  %v1438_v58 = vrot.slane %v1415_v62, 7 }
 0x696   : > { %v1460_v28 = vadd.f32 %v1452_v1, %v1380_v8  ;;  %v1459_v14 = vadd.f32 %v1451_v32, %v1379_v55 }
 0x697   : > { %v1445_v25 = vsel %vm886_vm8, %v1425_v47, %v1437_v22  ;;  %v1446_v36 = vsel %vm887_vm10, %v1426_v20, %v1438_v58 }
 0x698   : > { %1727 = vrcp.f32 %v1460_v28  ;;  %v1453_v7 = vrot.slane %v1445_v25, 3  ;;  %v1454_v17 = vrot.slane %v1446_v36, 3 }
 0x699   : > { %1729 = vrcp.f32 %v1459_v14 }
 0x69a   : > { %v1461_v37 = vadd.f32 %v1453_v7, %v1381_v21  ;;  %v1462_v56 = vadd.f32 %v1454_v17, %v1382_v49 }
 0x69c   : > { %1731 = vrcp.f32 %v1461_v37 }
 0x69d   : > { %1733 = vrcp.f32 %v1462_v56 }
 0x6a2   : > { %v1728_v50 = vpop.eup %1727 }
 0x6a3   : > { %v1730_v8 = vpop.eup %1729  ;;  %v1468_v18 = vmul.f32 %v1728_v50, %v2357_v23 }
 0x6a4   : > { %v1467_v29 = vmul.f32 %v1730_v8, %v2359_v19  ;;  %v1495_v13 = vpop.permute.xlu0 %1494 }
 0x6a5   : > { %v1478_v26 = vrot.slane %v1468_v18, %v1473_v16 }
 0x6a6   : > { %v1732_v52 = vpop.eup %1731  ;;  %v1474_v4 = vrot.slane %v1467_v29, %v1473_v16 }
 0x6a7   : > { %v1734_v31 = vpop.eup %1733  ;;  %v1488_v9 = vmul.f32 %v1478_v26, %v806_v6  ;;  %v1469_v10 = vmul.f32 %v1732_v52, %v2367_v53 }
 0x6a8   : > { %v1487_v55 = vmul.f32 %v1474_v4, %v804_v15  ;;  %v1470_v35 = vmul.f32 %v1734_v31, %v2371_v57 }
 0x6a9   : > { %v1498_v49 = vadd.f32 %v1495_v13, %v1488_v9  ;;  %v1482_v51 = vrot.slane %v1469_v10, %v1473_v16 }
 0x6aa   : > { %v1497_v23 = vadd.f32 %v1495_v13, %v1487_v55  ;;  %v1486_v3 = vrot.slane %v1470_v35, %v1473_v16 }
 0x6ab   : > { %1502 = vst [vmem:[%s259_s13 + $0x8] sm:$0xff] %v1498_v49  ;;  %v1489_v19 = vmul.f32 %v1482_v51, %v2489_v27 }
 0x6ac   : > { %1501 = vst [vmem:[%s259_s13] sm:$0xff] %v1497_v23  ;;  %v1490_v21 = vmul.f32 %v1486_v3, %v2491_v30 }
 0x6ad   : > { %v1499_v53 = vadd.f32 %v1495_v13, %v1489_v19 }
 0x6ae   : > { %v1500_v11 = vadd.f32 %v1495_v13, %v1490_v21 }
 0x6af   : > { %1503 = vst [vmem:[%s259_s13 + $0x10] sm:$0xff] %v1499_v53 }
 0x6b0   : > { %1504 = vst [vmem:[%s259_s13 + $0x18] sm:$0xff] %v1500_v11 }
 0x6b1   : > { %1776 = shalt.err (!%p1773_p7)
}
 0x6b2   : > { %s1777_s29 = scalar_lea.hbm %s2531_s18, 512  ;;  %s1781_s9 = scalar_lea.hbm %s2581_s6, 1024 }
 0x6b3   : > { %p1778_p8 = scmp.ne.s32.totalorder %s2531_s18, %s1777_s29  ;;  %p1782_p1 = scmp.lt.u32.totalorder %s2531_s18, %s2581_s6 }
 0x6b4   : > { %p1783_p0 = scmp.lt.u32.totalorder %s1781_s9, %s1777_s29  ;;  %p1785_p6 = scmp.lt.u32.totalorder %s1777_s29, %s2531_s18 }
 0x6b5   : > { %p1779_p11 = pnand %p1778_p8, %p2597_p9 }
 0x6b6   : > { %p1784_p5 = por %p1783_p0, %p1782_p1 }
 0x6b7   : > { %p1780_p13 = pneg %p1779_p11 }
 0x6b8   : > { %p1786_p10 = por %p1785_p6, %p1784_p5 }
 0x6ba   : > { %p1787_p12 = pnand %p1786_p10, %p1780_p13 }
 0x6bc   : > { %1790 = shalt.err (!%p1787_p12)
}
 0x6bd   : > { %1627 = dma.vmem_to_hbm [thread:$0]  (%p2597_p9), %s2533_s15, 512, %s2531_s18, %s1506_s25  }
 0x6be PF: > { %p1639_p2 = scmp.ge.s32.totalorder %s1829_s24, 2  ;;  %s1532_s14 = sand.u32 1, %s1817_s21  }
 0x6bf   : > { %p2598_p3 = scmp.ne.s32.totalorder %s2587_s8, 0  ;;  %s1533_s16 = scalar_lea.sflag [#allocation4], %s1532_s14 }
 0x6c1   : > { %p1634_p4 = pnand %p1639_p2, %p2598_p3 }
 0x6c3   : > { %1812 = dma.done.wait (!%p1634_p4), %s1533_s16, 512  }
 0x6c4   : > { %1814 = vsyncadd (!%p1634_p4), %s1533_s16, 4294966784  ;;  %p17_p7 = scmp.ge.s32.totalorder %s1907_s27, 4   ;;  %s2599_s21 = smov %s1821_s22 }
 0x6c5   : > { %s2600_s22 = smov %s1825_s23  ;;  %s2601_s23 = smov %s1918_s30 }
 0x6c6   : > { %s2602_s24 = smov %s1907_s27  ;;  %19 = sbr.rel (!%p17_p7) target bundleno = 4 (0x4), region = 84 }
 0x6cd   :  { %1538 = vsyncpa [#allocation3], 1 }
 0x6ce   :  { %1540 = vsyncpa [#allocation3 + $0x1], 1 }
 0x6cf   :  { %1541 = vsyncpa [#allocation4], 1 }
 0x6d0   :  { %1543 = vsyncpa [#allocation4 + $0x1], 1 }

</bundles_post_ra>
